<compile_context>
chip_gen: v6e
topology: v6e:2x2x1
jax: 0.10.0
libtpu: 0.0.40
codegen_flags: <defaults>
</compile_context>

<pallas_src>
import jax
import jax.numpy as jnp
from jax.experimental import pallas as pl
from jax.experimental.pallas import tpu as pltpu

# Scoped-VMEM limit: demo tiles are tiny; at real shapes the largest per-step
# footprint (conv2: double-buffered (4, 512, 576) bf16 patch block + weights +
# f32 matmul result) is ~7 MiB, so 32 MiB leaves ample headroom on every
# generation (v7x has only 64 MiB physical VMEM — do not raise past ~48 MiB).
_VMEM_LIMIT = 32 * 1024 * 1024


def _pick_tile(total, candidates):
    """Largest candidate that evenly divides `total`, else the full extent."""
    for c in candidates:
        if total % c == 0:
            return c
    return total


# ---------------------------------------------------------------------------
# Kernel 1: fused conv(3x3, pad 1) + ReLU + maxpool(2, 2), tiled over M.
# ---------------------------------------------------------------------------
def _conv_relu_pool_kernel(p_ref, w_ref, b_ref, o_ref):
    # p_ref: (4, tm, K) bf16 im2col patches (one slab per 2x2 pool quadrant)
    # w_ref: (K, Cout) bf16, b_ref: (1, Cout) f32, o_ref: (tm, Cout) bf16
    nq, tm, K = p_ref.shape
    cout = o_ref.shape[-1]
    # Single fused MXU matmul over all 4 quadrants (amortizes weight pushes).
    p = p_ref[...].reshape(nq * tm, K)
    r = jnp.dot(p, w_ref[...], preferred_element_type=jnp.float32)
    r = r.reshape(nq, tm, cout)
    # maxpool(relu(conv + b)) == relu(max_over_quadrants(conv) + b)
    acc = jnp.maximum(jnp.maximum(r[0], r[1]), jnp.maximum(r[2], r[3]))
    o_ref[...] = jnp.maximum(acc + b_ref[...], 0.0).astype(o_ref.dtype)


def _im2col_quadrants(x_nhwc):
    """(N,H,W,C) -> (4, N*Hh*Wh, 9*C) bf16.

    Features ordered (kh, kw, cin); rows grouped by 2x2 pool quadrant so every
    conv output appears exactly once (standard 9x im2col, quadrant-ordered).
    """
    N, H, W, C = x_nhwc.shape
    assert H % 2 == 0 and W % 2 == 0, "spatial dims must be even for 2x2 pool"
    Hh, Wh = H // 2, W // 2
    xb = x_nhwc.astype(jnp.bfloat16)
    xp = jnp.pad(xb, ((0, 0), (1, 1), (1, 1), (0, 0)))
    taps = [xp[:, dh:dh + H, dw:dw + W, :] for dh in range(3) for dw in range(3)]
    patches = jnp.concatenate(taps, axis=-1)                 # (N, H, W, 9C)
    patches = patches.reshape(N, Hh, 2, Wh, 2, 9 * C)
    patches = jnp.transpose(patches, (2, 4, 0, 1, 3, 5))     # (qi, qj, N, Hh, Wh, 9C)
    return patches.reshape(4, N * Hh * Wh, 9 * C)
    # TODO(synk): replace im2col (9x activation HBM traffic) with in-kernel
    # shifted-tap accumulation that reads the input only once (halo rows).


def conv_relu_pool(x_nhwc, w_mat, b_row, cout):
    """conv2d(3x3, stride 1, pad 1) + ReLU + maxpool(2,2); NHWC activations."""
    N, H, W, _ = x_nhwc.shape
    Hh, Wh = H // 2, W // 2
    M = N * Hh * Wh
    K = w_mat.shape[0]

    p = _im2col_quadrants(x_nhwc)                            # (4, M, K) bf16
    tm = _pick_tile(M, (512, 256, 128, 64, 32, 16, 8))       # 8-aligned M tiles

    out = pl.pallas_call(
        _conv_relu_pool_kernel,
        out_shape=jax.ShapeDtypeStruct((M, cout), jnp.bfloat16),
        grid_spec=pltpu.PrefetchScalarGridSpec(
            num_scalar_prefetch=0,
            grid=(M // tm,),
            in_specs=[
                pl.BlockSpec((4, tm, K), lambda i: (0, i, 0)),   # patch rows stream
                pl.BlockSpec((K, cout), lambda i: (0, 0)),       # weight resident
                pl.BlockSpec((1, cout), lambda i: (0, 0)),       # bias resident
            ],
            out_specs=pl.BlockSpec((tm, cout), lambda i: (i, 0)),
        ),
        compiler_params=pltpu.CompilerParams(
            dimension_semantics=("parallel",),     # M tiles independent (v7x 2 TCs)
            vmem_limit_bytes=_VMEM_LIMIT,
        ),
    )(p, w_mat, b_row)
    return out.reshape(N, Hh, Wh, cout)


# ---------------------------------------------------------------------------
# Kernel 2: fc1 (K-streamed reduction) + ReLU + (dropout = identity) + fc2.
# ---------------------------------------------------------------------------
def _mlp_kernel(x_ref, w1_ref, b1_ref, w2_ref, b2_ref, o_ref, acc_ref):
    k = pl.program_id(0)

    @pl.when(k == 0)
    def _init():
        acc_ref[...] = jnp.zeros_like(acc_ref)

    acc_ref[...] += jnp.dot(x_ref[...], w1_ref[...],
                            preferred_element_type=jnp.float32)

    @pl.when(k == pl.num_programs(0) - 1)
    def _finalize():
        h = jnp.maximum(acc_ref[...] + b1_ref[...], 0.0)
        # TODO(synk): nn.Dropout is identity in eval mode; no stochastic mask.
        o = jnp.dot(h.astype(w2_ref.dtype), w2_ref[...],
                    preferred_element_type=jnp.float32) + b2_ref[...]
        o_ref[...] = o.astype(o_ref.dtype)


def mlp_head(x_flat, w1_mat, b1_row, w2_mat, b2_row):
    M, K = x_flat.shape
    H1 = w1_mat.shape[1]
    C2 = w2_mat.shape[1]
    # K tile: streams the (huge at real scale) fc1 weight in 128-aligned chunks.
    # TODO(synk): on v5e consider pipeline_mode=pl.Buffered(3) on the weight spec
    # and on v6e an int8-quantized fc1 weight if this DMA is still exposed.
    tk = _pick_tile(K, (512, 256, 128))

    return pl.pallas_call(
        _mlp_kernel,
        out_shape=jax.ShapeDtypeStruct((M, C2), jnp.float32),
        grid_spec=pltpu.PrefetchScalarGridSpec(
            num_scalar_prefetch=0,
            grid=(K // tk,),
            in_specs=[
                pl.BlockSpec((M, tk), lambda k: (0, k)),      # activation K-slice
                pl.BlockSpec((tk, H1), lambda k: (k, 0)),     # fc1 weight K-slice
                pl.BlockSpec((1, H1), lambda k: (0, 0)),      # fc1 bias resident
                pl.BlockSpec((H1, C2), lambda k: (0, 0)),     # fc2 weight resident
                pl.BlockSpec((1, C2), lambda k: (0, 0)),      # fc2 bias resident
            ],
            out_specs=pl.BlockSpec((M, C2), lambda k: (0, 0)),
            scratch_shapes=[pltpu.VMEM((M, H1), jnp.float32)],
        ),
        compiler_params=pltpu.CompilerParams(
            dimension_semantics=("arbitrary",),   # K is a reduction axis
            vmem_limit_bytes=_VMEM_LIMIT,
        ),
    )(x_flat.astype(jnp.bfloat16), w1_mat, b1_row, w2_mat, b2_row)


# ---------------------------------------------------------------------------
# One-time parameter prep (host side): bf16 weights, kernel-friendly layouts,
# and the fc1 column permutation that replaces the pre-flatten transpose.
# ---------------------------------------------------------------------------
def prepare_params(params, pooled_hw):
    Hq, Wq = pooled_hw                      # spatial size after both pools

    def conv_w(w):                          # (Cout, Cin, 3, 3) -> (9*Cin, Cout)
        cout, cin = w.shape[0], w.shape[1]
        return (jnp.transpose(w, (2, 3, 1, 0))
                .reshape(9 * cin, cout).astype(jnp.bfloat16))

    hidden, fc1_in = params["fc1_w"].shape
    c2 = params["conv2_w"].shape[0]
    # fc1 weight columns: NCHW flatten (c,h,w) -> NHWC flatten (h,w,c).
    w1 = params["fc1_w"].reshape(hidden, c2, Hq, Wq)
    w1 = jnp.transpose(w1, (0, 2, 3, 1)).reshape(hidden, fc1_in)

    return {
        "conv1_w": conv_w(params["conv1_w"]),
        "conv1_b": params["conv1_b"].reshape(1, -1).astype(jnp.float32),
        "conv2_w": conv_w(params["conv2_w"]),
        "conv2_b": params["conv2_b"].reshape(1, -1).astype(jnp.float32),
        "fc1_w": w1.T.astype(jnp.bfloat16),                 # (fc1_in, hidden)
        "fc1_b": params["fc1_b"].reshape(1, -1).astype(jnp.float32),
        "fc2_w": params["fc2_w"].T.astype(jnp.bfloat16),    # (hidden, classes)
        "fc2_b": params["fc2_b"].reshape(1, -1).astype(jnp.float32),
    }


# ---------------------------------------------------------------------------
# Full forward (glue in plain JAX, hot paths in the Pallas kernels above).
# ---------------------------------------------------------------------------
def custom_cnn_forward(x_nchw, kparams):
    x = jnp.transpose(x_nchw, (0, 2, 3, 1))                  # NCHW -> NHWC (Cin=1)
    x = conv_relu_pool(x, kparams["conv1_w"], kparams["conv1_b"],
                       kparams["conv1_w"].shape[1])
    x = conv_relu_pool(x, kparams["conv2_w"], kparams["conv2_b"],
                       kparams["conv2_w"].shape[1])
    # NHWC flatten; fc1 weight was permuted to match, so no transpose here.
    x = x.reshape(x.shape[0], -1)
    return mlp_head(x, kparams["fc1_w"], kparams["fc1_b"],
                    kparams["fc2_w"], kparams["fc2_b"])


# Pure-JAX f32 reference (mirrors the PyTorch forward) for a correctness check.
def reference_forward(x_nchw, params):
    def block(y, w, b):
        y = jax.lax.conv_general_dilated(
            y, w, (1, 1), ((1, 1), (1, 1)),
            dimension_numbers=("NCHW", "OIHW", "NCHW"))
        y = jax.nn.relu(y + b.reshape(1, -1, 1, 1))
        return jax.lax.reduce_window(
            y, -jnp.inf, jax.lax.max, (1, 1, 2, 2), (1, 1, 2, 2), "VALID")

    y = block(x_nchw, params["conv1_w"], params["conv1_b"])
    y = block(y, params["conv2_w"], params["conv2_b"])
    y = y.reshape(y.shape[0], -1)
    y = jax.nn.relu(y @ params["fc1_w"].T + params["fc1_b"])
    return y @ params["fc2_w"].T + params["fc2_b"]


if __name__ == "__main__":
    # Small shapes consistent with the module: 1-channel input, two conv+pool
    # stages (spatial /4), fc1 in_features = 128 * (H//4) * (W//4)
    # (scaled-down analogue of 128 * 56 * 56).
    N, H, W = 2, 16, 16
    num_classes, hidden = 2, 256
    fc1_in = 128 * (H // 4) * (W // 4)

    ks = jax.random.split(jax.random.PRNGKey(0), 9)
    params = {
        "conv1_w": 0.10 * jax.random.normal(ks[0], (64, 1, 3, 3), jnp.float32),
        "conv1_b": 0.10 * jax.random.normal(ks[1], (64,), jnp.float32),
        "conv2_w": 0.05 * jax.random.normal(ks[2], (128, 64, 3, 3), jnp.float32),
        "conv2_b": 0.05 * jax.random.normal(ks[3], (128,), jnp.float32),
        "fc1_w":   0.02 * jax.random.normal(ks[4], (hidden, fc1_in), jnp.float32),
        "fc1_b":   0.02 * jax.random.normal(ks[5], (hidden,), jnp.float32),
        "fc2_w":   0.10 * jax.random.normal(ks[6], (num_classes, hidden), jnp.float32),
        "fc2_b":   0.10 * jax.random.normal(ks[7], (num_classes,), jnp.float32),
    }
    x = jax.random.normal(ks[8], (N, 1, H, W), jnp.float32)

    kparams = prepare_params(params, (H // 4, W // 4))
    fwd = jax.jit(custom_cnn_forward)

    out = jax.block_until_ready(fwd(x, kparams))
    ref = jax.block_until_ready(reference_forward(x, params))

    assert out.shape == (N, num_classes)
    # bf16 matmul operands vs. the f32 reference -> loose-but-meaningful bound.
    assert jnp.allclose(out, ref, atol=5e-2, rtol=5e-2), (out, ref)
    print("KERNEL_OK")
</pallas_src>

<mosaic_0001>
module attributes {stable_mosaic.version = 11 : i64} {
  func.func @_conv_relu_pool_kernel(%arg0: i32, %arg1: memref<4x128x9xbf16, #tpu.memory_space<vmem>>, %arg2: memref<9x64xbf16, #tpu.memory_space<vmem>>, %arg3: memref<1x64xf32, #tpu.memory_space<vmem>>, %arg4: memref<128x64xbf16, #tpu.memory_space<vmem>>) attributes {dimension_semantics = [#tpu.dimension_semantics<parallel>], iteration_bounds = array<i64: 1>, scalar_prefetch = 0 : i64, scratch_operands = 0 : i64, tpu.core_type = #tpu.core_type<tc>, window_params = [{transform_indices = @transform_0, window_bounds = array<i64: 4, 128, 9>}, {pipeline_mode = #tpu.pipeline_mode<synchronous>, transform_indices = @transform_1, window_bounds = array<i64: 9, 64>}, {pipeline_mode = #tpu.pipeline_mode<synchronous>, transform_indices = @transform_2, window_bounds = array<i64: 1, 64>}, {transform_indices = @transform_3, window_bounds = array<i64: 128, 64>}]} {
    %c0 = arith.constant 0 : index
    %c0_0 = arith.constant 0 : index
    %c0_1 = arith.constant 0 : index
    %0 = vector.load %arg1[%c0, %c0_0, %c0_1] : memref<4x128x9xbf16, #tpu.memory_space<vmem>>, vector<4x128x9xbf16>
    %1 = vector.shape_cast %0 : vector<4x128x9xbf16> to vector<512x9xbf16>
    %c0_2 = arith.constant 0 : index
    %c0_3 = arith.constant 0 : index
    %2 = vector.load %arg2[%c0_2, %c0_3] : memref<9x64xbf16, #tpu.memory_space<vmem>>, vector<9x64xbf16>
    %cst = arith.constant dense<0.000000e+00> : vector<512x64xf32>
    %3 = tpu.matmul %1, %2, %cst {dimension_numbers = #tpu.dot_dimension_numbers<[1], [0], [0], [1], [0, 0, 1, 1], [], []>} : vector<512x9xbf16>, vector<9x64xbf16>, vector<512x64xf32> -> vector<512x64xf32>
    %4 = vector.shape_cast %3 : vector<512x64xf32> to vector<4x128x64xf32>
    %5 = vector.extract_strided_slice %4 {offsets = [0, 0, 0], sizes = [1, 128, 64], strides = [1, 1, 1]} : vector<4x128x64xf32> to vector<1x128x64xf32>
    %6 = vector.shape_cast %5 : vector<1x128x64xf32> to vector<128x64xf32>
    %7 = vector.extract_strided_slice %4 {offsets = [1, 0, 0], sizes = [1, 128, 64], strides = [1, 1, 1]} : vector<4x128x64xf32> to vector<1x128x64xf32>
    %8 = vector.shape_cast %7 : vector<1x128x64xf32> to vector<128x64xf32>
    %9 = arith.maximumf %6, %8 : vector<128x64xf32>
    %10 = vector.extract_strided_slice %4 {offsets = [2, 0, 0], sizes = [1, 128, 64], strides = [1, 1, 1]} : vector<4x128x64xf32> to vector<1x128x64xf32>
    %11 = vector.shape_cast %10 : vector<1x128x64xf32> to vector<128x64xf32>
    %12 = vector.extract_strided_slice %4 {offsets = [3, 0, 0], sizes = [1, 128, 64], strides = [1, 1, 1]} : vector<4x128x64xf32> to vector<1x128x64xf32>
    %13 = vector.shape_cast %12 : vector<1x128x64xf32> to vector<128x64xf32>
    %14 = arith.maximumf %11, %13 : vector<128x64xf32>
    %15 = arith.maximumf %9, %14 : vector<128x64xf32>
    %c0_4 = arith.constant 0 : index
    %c0_5 = arith.constant 0 : index
    %16 = vector.load %arg3[%c0_4, %c0_5] : memref<1x64xf32, #tpu.memory_space<vmem>>, vector<1x64xf32>
    %17 = vector.broadcast %16 : vector<1x64xf32> to vector<128x64xf32>
    %18 = arith.addf %15, %17 : vector<128x64xf32>
    %cst_6 = arith.constant 0.000000e+00 : f32
    %19 = vector.broadcast %cst_6 : f32 to vector<128x64xf32>
    %20 = arith.maximumf %18, %19 : vector<128x64xf32>
    %21 = arith.truncf %20 : vector<128x64xf32> to vector<128x64xbf16>
    %c0_7 = arith.constant 0 : index
    %c0_8 = arith.constant 0 : index
    %22 = vector.load %arg4[%c0_7, %c0_8] : memref<128x64xbf16, #tpu.memory_space<vmem>>, vector<128x64xbf16>
    tpu.vector_store %arg4[%c0_7, %c0_8], %21 {strides = array<i32>} : memref<128x64xbf16, #tpu.memory_space<vmem>>, vector<128x64xbf16>,
    return
  }
  func.func @transform_0(%arg0: i32) -> (i32, i32, i32) {
    %c0_i32 = arith.constant 0 : i32
    %c0_i32_0 = arith.constant 0 : i32
    %c0_i32_1 = arith.constant 0 : i32
    return %c0_i32, %arg0, %c0_i32_0 : i32, i32, i32
  }
  func.func @transform_1(%arg0: i32) -> (i32, i32) {
    %c0_i32 = arith.constant 0 : i32
    %c0_i32_0 = arith.constant 0 : i32
    %c0_i32_1 = arith.constant 0 : i32
    return %c0_i32, %c0_i32_0 : i32, i32
  }
  func.func @transform_2(%arg0: i32) -> (i32, i32) {
    %c0_i32 = arith.constant 0 : i32
    %c0_i32_0 = arith.constant 0 : i32
    %c0_i32_1 = arith.constant 0 : i32
    return %c0_i32, %c0_i32_0 : i32, i32
  }
  func.func @transform_3(%arg0: i32) -> (i32, i32) {
    %c0_i32 = arith.constant 0 : i32
    %c0_i32_0 = arith.constant 0 : i32
    return %arg0, %c0_i32 : i32, i32
  }
}

module attributes {stable_mosaic.version = 11 : i64} {
  func.func @_conv_relu_pool_kernel(%arg0: i32, %arg1: memref<4x32x576xbf16, #tpu.memory_space<vmem>>, %arg2: memref<576x128xbf16, #tpu.memory_space<vmem>>, %arg3: memref<1x128xf32, #tpu.memory_space<vmem>>, %arg4: memref<32x128xbf16, #tpu.memory_space<vmem>>) attributes {dimension_semantics = [#tpu.dimension_semantics<parallel>], iteration_bounds = array<i64: 1>, scalar_prefetch = 0 : i64, scratch_operands = 0 : i64, tpu.core_type = #tpu.core_type<tc>, window_params = [{transform_indices = @transform_0, window_bounds = array<i64: 4, 32, 576>}, {pipeline_mode = #tpu.pipeline_mode<synchronous>, transform_indices = @transform_1, window_bounds = array<i64: 576, 128>}, {pipeline_mode = #tpu.pipeline_mode<synchronous>, transform_indices = @transform_2, window_bounds = array<i64: 1, 128>}, {transform_indices = @transform_3, window_bounds = array<i64: 32, 128>}]} {
    %c0 = arith.constant 0 : index
    %c0_0 = arith.constant 0 : index
    %c0_1 = arith.constant 0 : index
    %0 = vector.load %arg1[%c0, %c0_0, %c0_1] : memref<4x32x576xbf16, #tpu.memory_space<vmem>>, vector<4x32x576xbf16>
    %1 = vector.shape_cast %0 : vector<4x32x576xbf16> to vector<128x576xbf16>
    %c0_2 = arith.constant 0 : index
    %c0_3 = arith.constant 0 : index
    %2 = vector.load %arg2[%c0_2, %c0_3] : memref<576x128xbf16, #tpu.memory_space<vmem>>, vector<576x128xbf16>
    %cst = arith.constant dense<0.000000e+00> : vector<128x128xf32>
    %3 = tpu.matmul %1, %2, %cst {dimension_numbers = #tpu.dot_dimension_numbers<[1], [0], [0], [1], [0, 0, 1, 1], [], []>} : vector<128x576xbf16>, vector<576x128xbf16>, vector<128x128xf32> -> vector<128x128xf32>
    %4 = vector.shape_cast %3 : vector<128x128xf32> to vector<4x32x128xf32>
    %5 = vector.extract_strided_slice %4 {offsets = [0, 0, 0], sizes = [1, 32, 128], strides = [1, 1, 1]} : vector<4x32x128xf32> to vector<1x32x128xf32>
    %6 = vector.shape_cast %5 : vector<1x32x128xf32> to vector<32x128xf32>
    %7 = vector.extract_strided_slice %4 {offsets = [1, 0, 0], sizes = [1, 32, 128], strides = [1, 1, 1]} : vector<4x32x128xf32> to vector<1x32x128xf32>
    %8 = vector.shape_cast %7 : vector<1x32x128xf32> to vector<32x128xf32>
    %9 = arith.maximumf %6, %8 : vector<32x128xf32>
    %10 = vector.extract_strided_slice %4 {offsets = [2, 0, 0], sizes = [1, 32, 128], strides = [1, 1, 1]} : vector<4x32x128xf32> to vector<1x32x128xf32>
    %11 = vector.shape_cast %10 : vector<1x32x128xf32> to vector<32x128xf32>
    %12 = vector.extract_strided_slice %4 {offsets = [3, 0, 0], sizes = [1, 32, 128], strides = [1, 1, 1]} : vector<4x32x128xf32> to vector<1x32x128xf32>
    %13 = vector.shape_cast %12 : vector<1x32x128xf32> to vector<32x128xf32>
    %14 = arith.maximumf %11, %13 : vector<32x128xf32>
    %15 = arith.maximumf %9, %14 : vector<32x128xf32>
    %c0_4 = arith.constant 0 : index
    %c0_5 = arith.constant 0 : index
    %16 = vector.load %arg3[%c0_4, %c0_5] : memref<1x128xf32, #tpu.memory_space<vmem>>, vector<1x128xf32>
    %17 = vector.broadcast %16 : vector<1x128xf32> to vector<32x128xf32>
    %18 = arith.addf %15, %17 : vector<32x128xf32>
    %cst_6 = arith.constant 0.000000e+00 : f32
    %19 = vector.broadcast %cst_6 : f32 to vector<32x128xf32>
    %20 = arith.maximumf %18, %19 : vector<32x128xf32>
    %21 = arith.truncf %20 : vector<32x128xf32> to vector<32x128xbf16>
    %c0_7 = arith.constant 0 : index
    %c0_8 = arith.constant 0 : index
    %22 = vector.load %arg4[%c0_7, %c0_8] : memref<32x128xbf16, #tpu.memory_space<vmem>>, vector<32x128xbf16>
    tpu.vector_store %arg4[%c0_7, %c0_8], %21 {strides = array<i32>} : memref<32x128xbf16, #tpu.memory_space<vmem>>, vector<32x128xbf16>,
    return
  }
  func.func @transform_0(%arg0: i32) -> (i32, i32, i32) {
    %c0_i32 = arith.constant 0 : i32
    %c0_i32_0 = arith.constant 0 : i32
    %c0_i32_1 = arith.constant 0 : i32
    return %c0_i32, %arg0, %c0_i32_0 : i32, i32, i32
  }
  func.func @transform_1(%arg0: i32) -> (i32, i32) {
    %c0_i32 = arith.constant 0 : i32
    %c0_i32_0 = arith.constant 0 : i32
    %c0_i32_1 = arith.constant 0 : i32
    return %c0_i32, %c0_i32_0 : i32, i32
  }
  func.func @transform_2(%arg0: i32) -> (i32, i32) {
    %c0_i32 = arith.constant 0 : i32
    %c0_i32_0 = arith.constant 0 : i32
    %c0_i32_1 = arith.constant 0 : i32
    return %c0_i32, %c0_i32_0 : i32, i32
  }
  func.func @transform_3(%arg0: i32) -> (i32, i32) {
    %c0_i32 = arith.constant 0 : i32
    %c0_i32_0 = arith.constant 0 : i32
    return %arg0, %c0_i32 : i32, i32
  }
}

module attributes {stable_mosaic.version = 11 : i64} {
  func.func @_mlp_kernel(%arg0: i32, %arg1: memref<2x512xbf16, #tpu.memory_space<vmem>>, %arg2: memref<512x256xbf16, #tpu.memory_space<vmem>>, %arg3: memref<1x256xf32, #tpu.memory_space<vmem>>, %arg4: memref<256x2xbf16, #tpu.memory_space<vmem>>, %arg5: memref<1x2xf32, #tpu.memory_space<vmem>>, %arg6: memref<2x2xf32, #tpu.memory_space<vmem>>, %arg7: memref<2x256xf32, #tpu.memory_space<vmem>>) attributes {dimension_semantics = [#tpu.dimension_semantics<arbitrary>], iteration_bounds = array<i64: 4>, scalar_prefetch = 0 : i64, scratch_operands = 1 : i64, tpu.core_type = #tpu.core_type<tc>, window_params = [{transform_indices = @transform_0, window_bounds = array<i64: 2, 512>}, {transform_indices = @transform_1, window_bounds = array<i64: 512, 256>}, {pipeline_mode = #tpu.pipeline_mode<synchronous>, transform_indices = @transform_2, window_bounds = array<i64: 1, 256>}, {pipeline_mode = #tpu.pipeline_mode<synchronous>, transform_indices = @transform_3, window_bounds = array<i64: 256, 2>}, {pipeline_mode = #tpu.pipeline_mode<synchronous>, transform_indices = @transform_4, window_bounds = array<i64: 1, 2>}, {pipeline_mode = #tpu.pipeline_mode<synchronous>, transform_indices = @transform_5, window_bounds = array<i64: 2, 2>}]} {
    %c0_i32 = arith.constant 0 : i32
    %0 = arith.cmpi eq, %arg0, %c0_i32 : i32
    %1 = arith.extui %0 : i1 to i32
    %c0_i32_0 = arith.constant 0 : i32
    %2 = arith.cmpi ne, %1, %c0_i32_0 : i32
    scf.if %2 {
      %cst_9 = arith.constant 0.000000e+00 : f32
      %12 = vector.broadcast %cst_9 : f32 to vector<2x256xf32>
      %c0_10 = arith.constant 0 : index
      %c0_11 = arith.constant 0 : index
      %13 = vector.load %arg7[%c0_10, %c0_11] : memref<2x256xf32, #tpu.memory_space<vmem>>, vector<2x256xf32>
      tpu.vector_store %arg7[%c0_10, %c0_11], %12 {strides = array<i32>} : memref<2x256xf32, #tpu.memory_space<vmem>>, vector<2x256xf32>,
    } else {
    }
    %c0 = arith.constant 0 : index
    %c0_1 = arith.constant 0 : index
    %3 = vector.load %arg7[%c0, %c0_1] : memref<2x256xf32, #tpu.memory_space<vmem>>, vector<2x256xf32>
    %c0_2 = arith.constant 0 : index
    %c0_3 = arith.constant 0 : index
    %4 = vector.load %arg1[%c0_2, %c0_3] : memref<2x512xbf16, #tpu.memory_space<vmem>>, vector<2x512xbf16>
    %c0_4 = arith.constant 0 : index
    %c0_5 = arith.constant 0 : index
    %5 = vector.load %arg2[%c0_4, %c0_5] : memref<512x256xbf16, #tpu.memory_space<vmem>>, vector<512x256xbf16>
    %cst = arith.constant dense<0.000000e+00> : vector<2x256xf32>
    %6 = tpu.matmul %4, %5, %cst {dimension_numbers = #tpu.dot_dimension_numbers<[1], [0], [0], [1], [0, 0, 1, 1], [], []>} : vector<2x512xbf16>, vector<512x256xbf16>, vector<2x256xf32> -> vector<2x256xf32>
    %7 = arith.addf %3, %6 : vector<2x256xf32>
    %c0_6 = arith.constant 0 : index
    %c0_7 = arith.constant 0 : index
    %8 = vector.load %arg7[%c0_6, %c0_7] : memref<2x256xf32, #tpu.memory_space<vmem>>, vector<2x256xf32>
    tpu.vector_store %arg7[%c0_6, %c0_7], %7 {strides = array<i32>} : memref<2x256xf32, #tpu.memory_space<vmem>>, vector<2x256xf32>,
    %c3_i32 = arith.constant 3 : i32
    %9 = arith.cmpi eq, %arg0, %c3_i32 : i32
    %10 = arith.extui %9 : i1 to i32
    %c0_i32_8 = arith.constant 0 : i32
    %11 = arith.cmpi ne, %10, %c0_i32_8 : i32
    scf.if %11 {
      %c0_9 = arith.constant 0 : index
      %c0_10 = arith.constant 0 : index
      %12 = vector.load %arg7[%c0_9, %c0_10] : memref<2x256xf32, #tpu.memory_space<vmem>>, vector<2x256xf32>
      %c0_11 = arith.constant 0 : index
      %c0_12 = arith.constant 0 : index
      %13 = vector.load %arg3[%c0_11, %c0_12] : memref<1x256xf32, #tpu.memory_space<vmem>>, vector<1x256xf32>
      %14 = vector.broadcast %13 : vector<1x256xf32> to vector<2x256xf32>
      %15 = arith.addf %12, %14 : vector<2x256xf32>
      %cst_13 = arith.constant 0.000000e+00 : f32
      %16 = vector.broadcast %cst_13 : f32 to vector<2x256xf32>
      %17 = arith.maximumf %15, %16 : vector<2x256xf32>
      %18 = arith.truncf %17 : vector<2x256xf32> to vector<2x256xbf16>
      %c0_14 = arith.constant 0 : index
      %c0_15 = arith.constant 0 : index
      %19 = vector.load %arg4[%c0_14, %c0_15] : memref<256x2xbf16, #tpu.memory_space<vmem>>, vector<256x2xbf16>
      %cst_16 = arith.constant dense<0.000000e+00> : vector<2x2xf32>
      %20 = tpu.matmul %18, %19, %cst_16 {dimension_numbers = #tpu.dot_dimension_numbers<[1], [0], [0], [1], [0, 0, 1, 1], [], []>} : vector<2x256xbf16>, vector<256x2xbf16>, vector<2x2xf32> -> vector<2x2xf32>
      %c0_17 = arith.constant 0 : index
      %c0_18 = arith.constant 0 : index
      %21 = vector.load %arg5[%c0_17, %c0_18] : memref<1x2xf32, #tpu.memory_space<vmem>>, vector<1x2xf32>
      %22 = vector.broadcast %21 : vector<1x2xf32> to vector<2x2xf32>
      %23 = arith.addf %20, %22 : vector<2x2xf32>
      %c0_19 = arith.constant 0 : index
      %c0_20 = arith.constant 0 : index
      %24 = vector.load %arg6[%c0_19, %c0_20] : memref<2x2xf32, #tpu.memory_space<vmem>>, vector<2x2xf32>
      tpu.vector_store %arg6[%c0_19, %c0_20], %23 {strides = array<i32>} : memref<2x2xf32, #tpu.memory_space<vmem>>, vector<2x2xf32>,
    } else {
    }
    return
  }
  func.func @transform_0(%arg0: i32) -> (i32, i32) {
    %c0_i32 = arith.constant 0 : i32
    %c0_i32_0 = arith.constant 0 : i32
    return %c0_i32, %arg0 : i32, i32
  }
  func.func @transform_1(%arg0: i32) -> (i32, i32) {
    %c0_i32 = arith.constant 0 : i32
    %c0_i32_0 = arith.constant 0 : i32
    return %arg0, %c0_i32 : i32, i32
  }
  func.func @transform_2(%arg0: i32) -> (i32, i32) {
    %c0_i32 = arith.constant 0 : i32
    %c0_i32_0 = arith.constant 0 : i32
    %c0_i32_1 = arith.constant 0 : i32
    return %c0_i32, %c0_i32_0 : i32, i32
  }
  func.func @transform_3(%arg0: i32) -> (i32, i32) {
    %c0_i32 = arith.constant 0 : i32
    %c0_i32_0 = arith.constant 0 : i32
    %c0_i32_1 = arith.constant 0 : i32
    return %c0_i32, %c0_i32_0 : i32, i32
  }
  func.func @transform_4(%arg0: i32) -> (i32, i32) {
    %c0_i32 = arith.constant 0 : i32
    %c0_i32_0 = arith.constant 0 : i32
    %c0_i32_1 = arith.constant 0 : i32
    return %c0_i32, %c0_i32_0 : i32, i32
  }
  func.func @transform_5(%arg0: i32) -> (i32, i32) {
    %c0_i32 = arith.constant 0 : i32
    %c0_i32_0 = arith.constant 0 : i32
    %c0_i32_1 = arith.constant 0 : i32
    return %c0_i32, %c0_i32_0 : i32, i32
  }
}

</mosaic_0001>

<bundles_post_ra>
// kernel: custom_cnn_forward.3
= control target key start
LH: loop header
LB: loop body
LE: loop exit
PB: predicated region body
PF: predicated region fallthrough
CT: control target
= control target key end

     0   :  { %vm343_vm0 = vcmask 1043456   ;;  %vm344_vm1 = vcmask 1044480   ;;  %vm246_vm2 = vcmask 72704   ;;  %v1044_v1 = vmov 65535   ;;  %s1353_s1 = inlined_call_operand.vmem [shape: bf16[9,64], index: 1, kind: input, shape index: {}]   ;;  %s1354_s0 = inlined_call_operand.vmem [shape: bf16[4,128,9], index: 0, kind: input, shape index: {}]   ;;  %s1355_s2 = inlined_call_operand.vmem [shape: f32[1,64], index: 2, kind: input, shape index: {}]   ;;  %s1356_s3 = inlined_call_operand.vmem [shape: bf16[128,64], index: 3, kind: output, shape index: {}]  }
   0x1   :  { %v1011_v0 = vld [vmem:[%s1353_s1] sm:$0x1f]   ;;  %v345_v2 = vsel %vm343_vm0, 4294967295, %v1044_v1  ;;  %v1014_v7 = vld [vmem:[%s1354_s0 + $0x8] sm:$0xff]   ;;  %v1016_v9 = vld [vmem:[%s1354_s0 + $0x10] sm:$0xff]   ;;  %vm790_vm3 = vcmask 519168  }
   0x2   :  { %v1012_v3 = vld [vmem:[%s1354_s0] sm:$0xff]   ;;  %v346_v4 = vsel %vm344_vm1, %v345_v2, 0  ;;  %v1015_v8 = vld [vmem:[%s1354_s0 + $0x88] sm:$0xff]   ;;  %v1017_v10 = vld [vmem:[%s1354_s0 + $0x90] sm:$0xff]  }
   0x3   :  { %v1013_v5 = vld [vmem:[%s1354_s0 + $0x80] sm:$0xff]   ;;  %v348_v6 = vand.u32 %v1011_v0, %v346_v4  ;;  %944 = vmatprep.mubr.msk.bf16.mxu0 %vm246_vm2, %v1012_v3  ;;  %v1018_v11 = vld [vmem:[%s1354_s0 + $0x18] sm:$0xff]   ;;  %v1022_v15 = vld [vmem:[%s1354_s0 + $0x28] sm:$0xff]  }
   0x4   :  { %976 = vmatprep.mubr.msk.bf16.mxu1 %vm246_vm2, %v1013_v5  ;;  %v1019_v12 = vld [vmem:[%s1354_s0 + $0x98] sm:$0xff]   ;;  %v1020_v13 = vld [vmem:[%s1354_s0 + $0x20] sm:$0xff]   ;;  %v1023_v16 = vld [vmem:[%s1354_s0 + $0xa8] sm:$0xff]  }
   0x5   :  { %942 = vmatprep.subr.bf16.mxu0 %v348_v6  ;;  %1008 = vmatprep.subr.bf16.mxu1 %v348_v6  ;;  %v1021_v14 = vld [vmem:[%s1354_s0 + $0xa0] sm:$0xff]   ;;  %v1024_v17 = vld [vmem:[%s1354_s0 + $0x30] sm:$0xff]   ;;  %v1026_v19 = vld [vmem:[%s1354_s0 + $0x38] sm:$0xff]  }
   0x6   :  { %943 = vmatpush3.bf16.msra.mxu0 %v348_v6  ;;  %1009 = vmatpush3.bf16.msra.mxu1 %v348_v6  ;;  %v1025_v18 = vld [vmem:[%s1354_s0 + $0xb0] sm:$0xff]   ;;  %v1027_v20 = vld [vmem:[%s1354_s0 + $0xb8] sm:$0xff]   ;;  %v1028_v21 = vld [vmem:[%s1354_s0 + $0x40] sm:$0xff]  }
   0x7   :  { %v1029_v22 = vld [vmem:[%s1354_s0 + $0xc0] sm:$0xff]   ;;  %v1030_v23 = vld [vmem:[%s1354_s0 + $0x48] sm:$0xff]   ;;  %v1032_v25 = vld [vmem:[%s1354_s0 + $0x50] sm:$0xff]  }
   0x8   :  { %v1031_v24 = vld [vmem:[%s1354_s0 + $0xc8] sm:$0xff]   ;;  %v1033_v26 = vld [vmem:[%s1354_s0 + $0xd0] sm:$0xff]   ;;  %v1034_v27 = vld [vmem:[%s1354_s0 + $0x58] sm:$0xff]  }
   0x9   :  { %945 = vmatmul.mubr.msk.bf16.vlgmr.msra.gmra.mxu0 %vm246_vm2, %v1014_v7  ;;  %977 = vmatmul.mubr.msk.bf16.vlgmr.msra.gmra.mxu1 %vm246_vm2, %v1015_v8  ;;  %v1035_v28 = vld [vmem:[%s1354_s0 + $0xd8] sm:$0xff]   ;;  %v1036_v29 = vld [vmem:[%s1354_s0 + $0x60] sm:$0xff]   ;;  %v1038_v31 = vld [vmem:[%s1354_s0 + $0x68] sm:$0xff]  }
   0xa   :  { %948 = vmatprep.mubr.msk.bf16.mxu0 %vm246_vm2, %v1016_v9  ;;  %980 = vmatprep.mubr.msk.bf16.mxu1 %vm246_vm2, %v1017_v10  ;;  %v1037_v30 = vld [vmem:[%s1354_s0 + $0xe0] sm:$0xff]   ;;  %v1039_v32 = vld [vmem:[%s1354_s0 + $0xe8] sm:$0xff]   ;;  %v1040_v33 = vld [vmem:[%s1354_s0 + $0x70] sm:$0xff]  }
   0xb   :  { %v1041_v34 = vld [vmem:[%s1354_s0 + $0xf0] sm:$0xff]   ;;  %v1042_v35 = vld [vmem:[%s1354_s0 + $0x78] sm:$0xff]   ;;  %v1247_v9 = vld [vmem:[%s1355_s2] ss:$0 sm:$0xff] }
   0xc   :  { %v1043_v36 = vld [vmem:[%s1354_s0 + $0xf8] sm:$0xff]  }
  0x11   :  { %949 = vmatmul.mubr.msk.bf16.gmra.mxu0 %vm246_vm2, %v1018_v11  ;;  %981 = vmatmul.mubr.msk.bf16.gmra.mxu1 %vm246_vm2, %v1019_v12 }
  0x12   :  { %952 = vmatprep.mubr.msk.bf16.mxu0 %vm246_vm2, %v1020_v13  ;;  %984 = vmatprep.mubr.msk.bf16.mxu1 %vm246_vm2, %v1021_v14 }
  0x19   :  { %953 = vmatmul.mubr.msk.bf16.gmra.mxu0 %vm246_vm2, %v1022_v15  ;;  %985 = vmatmul.mubr.msk.bf16.gmra.mxu1 %vm246_vm2, %v1023_v16 }
  0x1a   :  { %956 = vmatprep.mubr.msk.bf16.mxu0 %vm246_vm2, %v1024_v17  ;;  %988 = vmatprep.mubr.msk.bf16.mxu1 %vm246_vm2, %v1025_v18 }
  0x21   :  { %957 = vmatmul.mubr.msk.bf16.gmra.mxu0 %vm246_vm2, %v1026_v19  ;;  %989 = vmatmul.mubr.msk.bf16.gmra.mxu1 %vm246_vm2, %v1027_v20 }
  0x22   :  { %960 = vmatprep.mubr.msk.bf16.mxu0 %vm246_vm2, %v1028_v21  ;;  %992 = vmatprep.mubr.msk.bf16.mxu1 %vm246_vm2, %v1029_v22 }
  0x29   :  { %961 = vmatmul.mubr.msk.bf16.gmra.mxu0 %vm246_vm2, %v1030_v23  ;;  %993 = vmatmul.mubr.msk.bf16.gmra.mxu1 %vm246_vm2, %v1031_v24 }
  0x2a   :  { %964 = vmatprep.mubr.msk.bf16.mxu0 %vm246_vm2, %v1032_v25  ;;  %996 = vmatprep.mubr.msk.bf16.mxu1 %vm246_vm2, %v1033_v26 }
  0x31   :  { %965 = vmatmul.mubr.msk.bf16.gmra.mxu0 %vm246_vm2, %v1034_v27  ;;  %997 = vmatmul.mubr.msk.bf16.gmra.mxu1 %vm246_vm2, %v1035_v28 }
  0x32   :  { %968 = vmatprep.mubr.msk.bf16.mxu0 %vm246_vm2, %v1036_v29  ;;  %1000 = vmatprep.mubr.msk.bf16.mxu1 %vm246_vm2, %v1037_v30 }
  0x39   :  { %969 = vmatmul.mubr.msk.bf16.gmra.mxu0 %vm246_vm2, %v1038_v31  ;;  %1001 = vmatmul.mubr.msk.bf16.gmra.mxu1 %vm246_vm2, %v1039_v32 }
  0x3a   :  { %972 = vmatprep.mubr.msk.bf16.mxu0 %vm246_vm2, %v1040_v33  ;;  %1004 = vmatprep.mubr.msk.bf16.mxu1 %vm246_vm2, %v1041_v34 }
  0x41   :  { %973 = vmatmul.mubr.msk.bf16.gmra.mxu0 %vm246_vm2, %v1042_v35  ;;  %1005 = vmatmul.mubr.msk.bf16.gmra.mxu1 %vm246_vm2, %v1043_v36 }
  0xc9   :  { %v946_v37 = vpop.f32.mrf.mxu0  ;;  %v978_v38 = vpop.f32.mrf.mxu1 }
  0xcb   :  { %v384_v39 = vpop.f32.mrf.mxu0  ;;  %v512_v40 = vpop.f32.mrf.mxu1 }
  0xcd   :  { %v947_v41 = vpop.f32.mrf.mxu0  ;;  %v979_v42 = vpop.f32.mrf.mxu1 }
  0xcf   :  { %v387_v43 = vpop.f32.mrf.mxu0  ;;  %v515_v44 = vpop.f32.mrf.mxu1 }
  0xd1   :  { %v1196_v45 = vpop.f32.mrf.mxu0  ;;  %v1198_v46 = vpop.f32.mrf.mxu1 }
  0xd3   :  { %v1200_v47 = vpop.f32.mrf.mxu0  ;;  %v1202_v48 = vpop.f32.mrf.mxu1 }
  0xd5   :  { %v1204_v49 = vpop.f32.mrf.mxu0  ;;  %v1206_v50 = vpop.f32.mrf.mxu1 }
  0xd7   :  { %v1208_v51 = vpop.f32.mrf.mxu0  ;;  %v1210_v52 = vpop.f32.mrf.mxu1 }
  0xd9   :  { %v1212_v53 = vpop.f32.mrf.mxu0  ;;  %v1214_v54 = vpop.f32.mrf.mxu1 }
  0xdb   :  { %v1216_v55 = vpop.f32.mrf.mxu0  ;;  %v1218_v56 = vpop.f32.mrf.mxu1 }
  0xdd   :  { %v1220_v57 = vpop.f32.mrf.mxu0  ;;  %v1222_v58 = vpop.f32.mrf.mxu1 }
  0xdf   :  { %v1224_v59 = vpop.f32.mrf.mxu0  ;;  %v1226_v60 = vpop.f32.mrf.mxu1 }
  0xe1   :  { %v1228_v61 = vpop.f32.mrf.mxu0  ;;  %v1230_v62 = vpop.f32.mrf.mxu1 }
  0xe3   :  { %v1232_v63 = vpop.f32.mrf.mxu0  ;;  %v1234_v0 = vpop.f32.mrf.mxu1 }
  0xe5   :  { %v1236_v1 = vpop.f32.mrf.mxu0  ;;  %v1238_v2 = vpop.f32.mrf.mxu1 }
  0xe7   :  { %v1240_v3 = vpop.f32.mrf.mxu0  ;;  %v1242_v4 = vpop.f32.mrf.mxu1 }
  0xe9   :  { %v962_v5 = vpop.f32.mrf.mxu0  ;;  %v994_v6 = vpop.f32.mrf.mxu1 }
  0xea   :  { %v641_v7 = vmax.f32 %v946_v37, %v962_v5  ;;  %v657_v8 = vmax.f32 %v978_v38, %v994_v6 }
  0xeb   :  { %v448_v10 = vpop.f32.mrf.mxu0  ;;  %v576_v11 = vpop.f32.mrf.mxu1 }
  0xec   :  { %v673_v12 = vmax.f32 %v641_v7, %v657_v8  ;;  %v639_v13 = vmax.f32 %v384_v39, %v448_v10  ;;  %v655_v14 = vmax.f32 %v512_v40, %v576_v11 }
  0xed   :  { %v963_v15 = vpop.f32.mrf.mxu0  ;;  %v995_v16 = vpop.f32.mrf.mxu1 }
  0xee   :  { %v696_v17 = vadd.f32 %v1247_v9, %v673_v12  ;;  %v671_v18 = vmax.f32 %v639_v13, %v655_v14  ;;  %v642_v19 = vmax.f32 %v947_v41, %v963_v15  ;;  %v658_v20 = vmax.f32 %v979_v42, %v995_v16 }
  0xef   :  { %v451_v21 = vpop.f32.mrf.mxu0  ;;  %v579_v22 = vpop.f32.mrf.mxu1 }
  0xf0   :  { %v712_v23 = vmax.f32 %v696_v17, 0.0  ;;  %v694_v24 = vadd.f32 %v1247_v9, %v671_v18  ;;  %v674_v25 = vmax.f32 %v642_v19, %v658_v20  ;;  %v640_v26 = vmax.f32 %v387_v43, %v451_v21 }
  0xf1   :  { %v656_v27 = vmax.f32 %v515_v44, %v579_v22  ;;  %v966_v28 = vpop.f32.mrf.mxu0  ;;  %v998_v29 = vpop.f32.mrf.mxu1 }
  0xf2   :  { %v895_v30 = vpack.c.bf16 %v712_v23, %v712_v23  ;;  %v710_v31 = vmax.f32 %v694_v24, 0.0  ;;  %v697_v32 = vadd.f32 %v1247_v9, %v674_v25  ;;  %v645_v33 = vmax.f32 %v1196_v45, %v966_v28 }
  0xf3   :  { %v672_v34 = vmax.f32 %v640_v26, %v656_v27  ;;  %v661_v35 = vmax.f32 %v1198_v46, %v998_v29  ;;  %v464_v36 = vpop.f32.mrf.mxu0  ;;  %v592_v37 = vpop.f32.mrf.mxu1 }
  0xf4   :  { %793 = vst.msk [vmem:[%s1356_s3 + $0x8] sm:$0xf] %vm790_vm3, %v895_v30  ;;  %v893_v38 = vpack.c.bf16 %v710_v31, %v710_v31  ;;  %v713_v39 = vmax.f32 %v697_v32, 0.0  ;;  %v643_v40 = vmax.f32 %v1200_v47, %v464_v36  ;;  %v659_v41 = vmax.f32 %v1202_v48, %v592_v37 }
  0xf5   :  { %v695_v42 = vadd.f32 %v1247_v9, %v672_v34  ;;  %v677_v43 = vmax.f32 %v645_v33, %v661_v35  ;;  %v967_v44 = vpop.f32.mrf.mxu0  ;;  %v999_v45 = vpop.f32.mrf.mxu1 }
  0xf6   :  { %791 = vst.msk [vmem:[%s1356_s3] sm:$0xf] %vm790_vm3, %v893_v38  ;;  %v896_v46 = vpack.c.bf16 %v713_v39, %v713_v39  ;;  %v675_v5 = vmax.f32 %v643_v40, %v659_v41  ;;  %v646_v6 = vmax.f32 %v1204_v49, %v967_v44  ;;  %v662_v7 = vmax.f32 %v1206_v50, %v999_v45 }
  0xf7   :  { %v711_v8 = vmax.f32 %v695_v42, 0.0  ;;  %v700_v47 = vadd.f32 %v1247_v9, %v677_v43  ;;  %v467_v48 = vpop.f32.mrf.mxu0  ;;  %v595_v10 = vpop.f32.mrf.mxu1 }
  0xf8   :  { %794 = vst.msk [vmem:[%s1356_s3 + $0xc] sm:$0xf] %vm790_vm3, %v896_v46  ;;  %v698_v11 = vadd.f32 %v1247_v9, %v675_v5  ;;  %v678_v12 = vmax.f32 %v646_v6, %v662_v7  ;;  %v644_v13 = vmax.f32 %v1208_v51, %v467_v48  ;;  %v660_v14 = vmax.f32 %v1210_v52, %v595_v10 }
  0xf9   :  { %v894_v49 = vpack.c.bf16 %v711_v8, %v711_v8  ;;  %v716_v15 = vmax.f32 %v700_v47, 0.0  ;;  %v970_v50 = vpop.f32.mrf.mxu0  ;;  %v1002_v16 = vpop.f32.mrf.mxu1 }
  0xfa   :  { %v714_v17 = vmax.f32 %v698_v11, 0.0  ;;  %v701_v18 = vadd.f32 %v1247_v9, %v678_v12  ;;  %v676_v19 = vmax.f32 %v644_v13, %v660_v14  ;;  %v649_v20 = vmax.f32 %v1212_v53, %v970_v50 }
  0xfb   :  { %792 = vst.msk [vmem:[%s1356_s3 + $0x4] sm:$0xf] %vm790_vm3, %v894_v49  ;;  %v899_v21 = vpack.c.bf16 %v716_v15, %v716_v15  ;;  %v665_v51 = vmax.f32 %v1214_v54, %v1002_v16  ;;  %v480_v22 = vpop.f32.mrf.mxu0  ;;  %v608_v52 = vpop.f32.mrf.mxu1 }
  0xfc   :  { %v897_v23 = vpack.c.bf16 %v714_v17, %v714_v17  ;;  %v717_v24 = vmax.f32 %v701_v18, 0.0  ;;  %v699_v25 = vadd.f32 %v1247_v9, %v676_v19  ;;  %v647_v26 = vmax.f32 %v1216_v55, %v480_v22 }
  0xfd   :  { %797 = vst.msk [vmem:[%s1356_s3 + $0x18] sm:$0xf] %vm790_vm3, %v899_v21  ;;  %v681_v53 = vmax.f32 %v649_v20, %v665_v51  ;;  %v663_v27 = vmax.f32 %v1218_v56, %v608_v52  ;;  %v971_v28 = vpop.f32.mrf.mxu0  ;;  %v1003_v29 = vpop.f32.mrf.mxu1 }
  0xfe   :  { %795 = vst.msk [vmem:[%s1356_s3 + $0x10] sm:$0xf] %vm790_vm3, %v897_v23  ;;  %v900_v54 = vpack.c.bf16 %v717_v24, %v717_v24  ;;  %v715_v30 = vmax.f32 %v699_v25, 0.0  ;;  %v650_v31 = vmax.f32 %v1220_v57, %v971_v28  ;;  %v666_v55 = vmax.f32 %v1222_v58, %v1003_v29 }
  0xff   :  { %v704_v32 = vadd.f32 %v1247_v9, %v681_v53  ;;  %v679_v33 = vmax.f32 %v647_v26, %v663_v27  ;;  %v483_v34 = vpop.f32.mrf.mxu0  ;;  %v611_v35 = vpop.f32.mrf.mxu1 }
 0x100   :  { %798 = vst.msk [vmem:[%s1356_s3 + $0x1c] sm:$0xf] %vm790_vm3, %v900_v54  ;;  %v898_v56 = vpack.c.bf16 %v715_v30, %v715_v30  ;;  %v682_v36 = vmax.f32 %v650_v31, %v666_v55  ;;  %v648_v37 = vmax.f32 %v1224_v59, %v483_v34  ;;  %v664_v38 = vmax.f32 %v1226_v60, %v611_v35 }
 0x101   :  { %v720_v39 = vmax.f32 %v704_v32, 0.0  ;;  %v702_v57 = vadd.f32 %v1247_v9, %v679_v33  ;;  %v974_v58 = vpop.f32.mrf.mxu0  ;;  %v1006_v40 = vpop.f32.mrf.mxu1 }
 0x102   :  { %796 = vst.msk [vmem:[%s1356_s3 + $0x14] sm:$0xf] %vm790_vm3, %v898_v56  ;;  %v705_v41 = vadd.f32 %v1247_v9, %v682_v36  ;;  %v680_v42 = vmax.f32 %v648_v37, %v664_v38  ;;  %v653_v43 = vmax.f32 %v1228_v61, %v974_v58  ;;  %v669_v44 = vmax.f32 %v1230_v62, %v1006_v40 }
 0x103   :  { %v903_v59 = vpack.c.bf16 %v720_v39, %v720_v39  ;;  %v718_v45 = vmax.f32 %v702_v57, 0.0  ;;  %v496_v60 = vpop.f32.mrf.mxu0  ;;  %v624_v46 = vpop.f32.mrf.mxu1 }
 0x104   :  { %v721_v5 = vmax.f32 %v705_v41, 0.0  ;;  %v703_v6 = vadd.f32 %v1247_v9, %v680_v42  ;;  %v685_v7 = vmax.f32 %v653_v43, %v669_v44  ;;  %v651_v8 = vmax.f32 %v1232_v63, %v496_v60 }
 0x105   :  { %801 = vst.msk [vmem:[%s1356_s3 + $0x28] sm:$0xf] %vm790_vm3, %v903_v59  ;;  %v901_v47 = vpack.c.bf16 %v718_v45, %v718_v45  ;;  %v667_v61 = vmax.f32 %v1234_v0, %v624_v46  ;;  %v975_v48 = vpop.f32.mrf.mxu0  ;;  %v1007_v62 = vpop.f32.mrf.mxu1 }
 0x106   :  { %v904_v10 = vpack.c.bf16 %v721_v5, %v721_v5  ;;  %v719_v11 = vmax.f32 %v703_v6, 0.0  ;;  %v708_v12 = vadd.f32 %v1247_v9, %v685_v7  ;;  %v654_v13 = vmax.f32 %v1236_v1, %v975_v48 }
 0x107   :  { %799 = vst.msk [vmem:[%s1356_s3 + $0x20] sm:$0xf] %vm790_vm3, %v901_v47  ;;  %v683_v63 = vmax.f32 %v651_v8, %v667_v61  ;;  %v670_v14 = vmax.f32 %v1238_v2, %v1007_v62  ;;  %v499_v49 = vpop.f32.mrf.mxu0  ;;  %v627_v15 = vpop.f32.mrf.mxu1 }
 0x108   :  { %802 = vst.msk [vmem:[%s1356_s3 + $0x2c] sm:$0xf] %vm790_vm3, %v904_v10  ;;  %v902_v0 = vpack.c.bf16 %v719_v11, %v719_v11  ;;  %v724_v50 = vmax.f32 %v708_v12, 0.0  ;;  %v652_v16 = vmax.f32 %v1240_v3, %v499_v49  ;;  %v668_v1 = vmax.f32 %v1242_v4, %v627_v15 }
 0x109   :  { %v706_v17 = vadd.f32 %v1247_v9, %v683_v63  ;;  %v686_v18 = vmax.f32 %v654_v13, %v670_v14 }
 0x10a   :  { %800 = vst.msk [vmem:[%s1356_s3 + $0x24] sm:$0xf] %vm790_vm3, %v902_v0  ;;  %v907_v2 = vpack.c.bf16 %v724_v50, %v724_v50  ;;  %v684_v19 = vmax.f32 %v652_v16, %v668_v1 }
 0x10b   :  { %v722_v20 = vmax.f32 %v706_v17, 0.0  ;;  %v709_v21 = vadd.f32 %v1247_v9, %v686_v18 }
 0x10c   :  { %805 = vst.msk [vmem:[%s1356_s3 + $0x38] sm:$0xf] %vm790_vm3, %v907_v2  ;;  %v707_v3 = vadd.f32 %v1247_v9, %v684_v19 }
 0x10d   :  { %v905_v4 = vpack.c.bf16 %v722_v20, %v722_v20  ;;  %v725_v51 = vmax.f32 %v709_v21, 0.0 }
 0x10e   :  { %v723_v22 = vmax.f32 %v707_v3, 0.0 }
 0x10f   :  { %803 = vst.msk [vmem:[%s1356_s3 + $0x30] sm:$0xf] %vm790_vm3, %v905_v4  ;;  %v908_v52 = vpack.c.bf16 %v725_v51, %v725_v51 }
 0x110   :  { %v906_v23 = vpack.c.bf16 %v723_v22, %v723_v22 }
 0x111   :  { %806 = vst.msk [vmem:[%s1356_s3 + $0x3c] sm:$0xf] %vm790_vm3, %v908_v52 }
 0x112   :  { %804 = vst.msk [vmem:[%s1356_s3 + $0x34] sm:$0xf] %vm790_vm3, %v906_v23 }

// kernel: custom_cnn_forward.4
= control target key start
LH: loop header
LB: loop body
LE: loop exit
PB: predicated region body
PF: predicated region fallthrough
CT: control target
= control target key end

     0   :  { %vm551_vm0 = vcmask 523264   ;;  %s1560_s1 = inlined_call_operand.vmem [shape: bf16[576,128], index: 1, kind: input, shape index: {}]   ;;  %s1561_s0 = inlined_call_operand.vmem [shape: bf16[4,32,576], index: 0, kind: input, shape index: {}]   ;;  %s1562_s2 = inlined_call_operand.vmem [shape: f32[1,128], index: 2, kind: input, shape index: {}]   ;;  %s1563_s3 = inlined_call_operand.vmem [shape: bf16[32,128], index: 3, kind: output, shape index: {}]  }
   0x1   :  { %v1194_v0 = vld [vmem:[%s1560_s1 + $0x78] sm:$0xff]   ;;  %v1198_v4 = vld [vmem:[%s1560_s1 + $0x70] sm:$0xff]   ;;  %v1202_v8 = vld [vmem:[%s1560_s1 + $0x68] sm:$0xff]  }
   0x2   :  { %v1195_v1 = vld [vmem:[%s1560_s1 + $0xf8] sm:$0xff]   ;;  %1022 = vmatprep.subr.bf16.mxu0 %v1194_v0  ;;  %v1199_v5 = vld [vmem:[%s1560_s1 + $0xf0] sm:$0xff]   ;;  %v1203_v9 = vld [vmem:[%s1560_s1 + $0xe8] sm:$0xff]  }
   0x3   :  { %v1196_v2 = vld [vmem:[%s1560_s1 + $0x38] sm:$0xff]   ;;  %1086 = vmatprep.subr.bf16.mxu1 %v1195_v1  ;;  %v1200_v6 = vld [vmem:[%s1560_s1 + $0x30] sm:$0xff]   ;;  %v1204_v10 = vld [vmem:[%s1560_s1 + $0x28] sm:$0xff]  }
   0x4   :  { %v1197_v3 = vld [vmem:[%s1560_s1 + $0xb8] sm:$0xff]   ;;  %1023 = vmatpush3.bf16.msra.mxu0 %v1196_v2  ;;  %v1201_v7 = vld [vmem:[%s1560_s1 + $0xb0] sm:$0xff]   ;;  %v1205_v11 = vld [vmem:[%s1560_s1 + $0xa8] sm:$0xff]  }
   0x5   :  { %1087 = vmatpush3.bf16.msra.mxu1 %v1197_v3  ;;  %1024 = vmatprep.subr.bf16.mxu0 %v1198_v4  ;;  %v1206_v12 = vld [vmem:[%s1560_s1 + $0x60] sm:$0xff]   ;;  %v1210_v16 = vld [vmem:[%s1560_s1 + $0x58] sm:$0xff]   ;;  %v1214_v20 = vld [vmem:[%s1560_s1 + $0x50] sm:$0xff]  }
   0x6   :  { %1088 = vmatprep.subr.bf16.mxu1 %v1199_v5  ;;  %v1207_v13 = vld [vmem:[%s1560_s1 + $0xe0] sm:$0xff]   ;;  %v1211_v17 = vld [vmem:[%s1560_s1 + $0xd8] sm:$0xff]   ;;  %v1215_v21 = vld [vmem:[%s1560_s1 + $0xd0] sm:$0xff]  }
   0x7   :  { %v1208_v14 = vld [vmem:[%s1560_s1 + $0x20] sm:$0xff]   ;;  %v1212_v18 = vld [vmem:[%s1560_s1 + $0x18] sm:$0xff]   ;;  %v1216_v22 = vld [vmem:[%s1560_s1 + $0x10] sm:$0xff]  }
   0x8   :  { %1025 = vmatpush3.bf16.msra.mxu0 %v1200_v6  ;;  %v1209_v15 = vld [vmem:[%s1560_s1 + $0xa0] sm:$0xff]   ;;  %v1213_v19 = vld [vmem:[%s1560_s1 + $0x98] sm:$0xff]   ;;  %v1217_v23 = vld [vmem:[%s1560_s1 + $0x90] sm:$0xff]  }
   0x9   :  { %1089 = vmatpush3.bf16.msra.mxu1 %v1201_v7  ;;  %1026 = vmatprep.subr.bf16.mxu0 %v1202_v8  ;;  %v1218_v24 = vld [vmem:[%s1560_s1 + $0x48] sm:$0xff]   ;;  %v1222_v28 = vld [vmem:[%s1560_s1 + $0x40] sm:$0xff]   ;;  %v1232_v36 = vld [vmem:[%s1560_s1 + $0x118] sm:$0xff]  }
   0xa   :  { %1090 = vmatprep.subr.bf16.mxu1 %v1203_v9  ;;  %v1219_v25 = vld [vmem:[%s1560_s1 + $0xc8] sm:$0xff]   ;;  %v1223_v29 = vld [vmem:[%s1560_s1 + $0xc0] sm:$0xff]   ;;  %v1245_v42 = vld [vmem:[%s1560_s1 + $0x110] sm:$0xff]  }
   0xb   :  { %v1220_v26 = vld [vmem:[%s1560_s1 + $0x8] sm:$0xff]   ;;  %v1224_v30 = vld [vmem:[%s1560_s1] sm:$0xff]   ;;  %v1241_v43 = vld [vmem:[%s1561_s0 + $0x5c] ss:$20 sps:$4 sm:$0xff]  }
   0xc   :  { %1027 = vmatpush3.bf16.msra.mxu0 %v1204_v10  ;;  %v1221_v27 = vld [vmem:[%s1560_s1 + $0x88] sm:$0xff]   ;;  %v1225_v31 = vld [vmem:[%s1560_s1 + $0x80] sm:$0xff]   ;;  %v1246_v47 = vld [vmem:[%s1561_s0 + $0x7c] ss:$20 sps:$4 sm:$0xff]  }
   0xd   :  { %1091 = vmatpush3.bf16.msra.mxu1 %v1205_v11  ;;  %1028 = vmatprep.subr.bf16.mxu0 %v1206_v12  ;;  %v1226_v32 = vld [vmem:[%s1561_s0] ss:$20 sps:$4 sm:$0xff]   ;;  %v1228_v33 = vld [vmem:[%s1561_s0 + $0x4] ss:$20 sps:$4 sm:$0xff]   ;;  %v1229_v34 = vld [vmem:[%s1561_s0 + $0x8] ss:$20 sps:$4 sm:$0xff]  }
   0xe   :  { %1092 = vmatprep.subr.bf16.mxu1 %v1207_v13  ;;  %v1231_v35 = vld [vmem:[%s1561_s0 + $0xc] ss:$20 sps:$4 sm:$0xff]   ;;  %608 = vmatprep.mubr.bf16.mxu0 %v1228_v33  ;;  %v1235_v38 = vld [vmem:[%s1561_s0 + $0x34] ss:$20 sps:$4 sm:$0xff]   ;;  %v1238_v40 = vld [vmem:[%s1561_s0 + $0x30] ss:$20 sps:$4 sm:$0xff]  }
   0xf   :  { %705 = vmatprep.mubr.bf16.mxu1 %v1231_v35  ;;  %v1233_v37 = vld [vmem:[%s1561_s0 + $0x2c] ss:$20 sps:$4 sm:$0xff]   ;;  %v1237_v39 = vld [vmem:[%s1561_s0 + $0x28] ss:$20 sps:$4 sm:$0xff]   ;;  %v1243_v44 = vld [vmem:[%s1561_s0 + $0x50] ss:$20 sps:$4 sm:$0xff]  }
  0x10   :  { %1029 = vmatpush3.bf16.msra.mxu0 %v1208_v14  ;;  %v1239_v41 = vld [vmem:[%s1561_s0 + $0x54] ss:$20 sps:$4 sm:$0xff]   ;;  %v1244_v45 = vld [vmem:[%s1561_s0 + $0x58] ss:$20 sps:$4 sm:$0xff]   ;;  %v1271_v49 = vld [vmem:[%s1560_s1 + $0x100] sm:$0xff]  }
  0x11   :  { %1093 = vmatpush3.bf16.msra.mxu1 %v1209_v15  ;;  %1030 = vmatprep.subr.bf16.mxu0 %v1210_v16  ;;  %v1258_v46 = vld [vmem:[%s1560_s1 + $0x108] sm:$0xff]   ;;  %v1248_v48 = vld [vmem:[%s1561_s0 + $0x84] ss:$20 sps:$4 sm:$0xff]   ;;  %v1251_v51 = vld [vmem:[%s1561_s0 + $0x80] ss:$20 sps:$4 sm:$0xff]  }
  0x12   :  { %1094 = vmatprep.subr.bf16.mxu1 %v1211_v17  ;;  %v1250_v50 = vld [vmem:[%s1561_s0 + $0x78] ss:$20 sps:$4 sm:$0xff]   ;;  %v1256_v54 = vld [vmem:[%s1561_s0 + $0xa0] ss:$20 sps:$4 sm:$0xff]   ;;  %v1257_v55 = vld [vmem:[%s1561_s0 + $0xa8] ss:$20 sps:$4 sm:$0xff]  }
  0x13   :  { %v1252_v52 = vld [vmem:[%s1561_s0 + $0xa4] ss:$20 sps:$4 sm:$0xff]   ;;  %v1254_v53 = vld [vmem:[%s1561_s0 + $0xac] ss:$20 sps:$4 sm:$0xff]   ;;  %v1261_v57 = vld [vmem:[%s1561_s0 + $0xd4] ss:$20 sps:$4 sm:$0xff]  }
  0x14   :  { %1031 = vmatpush3.bf16.msra.mxu0 %v1212_v18  ;;  %v1259_v56 = vld [vmem:[%s1561_s0 + $0xcc] ss:$20 sps:$4 sm:$0xff]   ;;  %v1263_v58 = vld [vmem:[%s1561_s0 + $0xc8] ss:$20 sps:$4 sm:$0xff]   ;;  %v1264_v59 = vld [vmem:[%s1561_s0 + $0xd0] ss:$20 sps:$4 sm:$0xff]  }
  0x15   :  { %1095 = vmatpush3.bf16.msra.mxu1 %v1213_v19  ;;  %1032 = vmatprep.subr.bf16.mxu0 %v1214_v20  ;;  %v1265_v60 = vld [vmem:[%s1561_s0 + $0xf4] ss:$20 sps:$4 sm:$0xff]   ;;  %v1267_v61 = vld [vmem:[%s1561_s0 + $0xfc] ss:$20 sps:$4 sm:$0xff]   ;;  %v1270_v63 = vld [vmem:[%s1561_s0 + $0xf8] ss:$20 sps:$4 sm:$0xff]  }
  0x16   :  { %1096 = vmatprep.subr.bf16.mxu1 %v1215_v21  ;;  %v1269_v62 = vld [vmem:[%s1561_s0 + $0xf0] ss:$20 sps:$4 sm:$0xff]   ;;  %v1276_v2 = vld [vmem:[%s1561_s0 + $0x118] ss:$20 sps:$4 sm:$0xff]   ;;  %v1277_v3 = vld [vmem:[%s1561_s0 + $0x120] ss:$20 sps:$4 sm:$0xff]  }
  0x17   :  { %v1272_v0 = vld [vmem:[%s1561_s0 + $0x11c] ss:$20 sps:$4 sm:$0xff]   ;;  %v1274_v1 = vld [vmem:[%s1561_s0 + $0x124] ss:$20 sps:$4 sm:$0xff]   ;;  %v1282_v8 = vld [vmem:[%s1561_s0 + $0x60] ss:$20 sps:$4 sm:$0xff]  }
  0x18   :  { %1033 = vmatpush3.bf16.msra.mxu0 %v1216_v22  ;;  %v1278_v4 = vld [vmem:[%s1561_s0 + $0x10] ss:$20 sps:$4 sm:$0xff]   ;;  %v1280_v6 = vld [vmem:[%s1561_s0 + $0x38] ss:$20 sps:$4 sm:$0xff]   ;;  %v1283_v9 = vld [vmem:[%s1561_s0 + $0x100] ss:$20 sps:$4 sm:$0xff]  }
  0x19   :  { %1097 = vmatpush3.bf16.msra.mxu1 %v1217_v23  ;;  %1034 = vmatprep.subr.bf16.mxu0 %v1218_v24  ;;  %v1279_v5 = vld [vmem:[%s1561_s0 + $0xb0] ss:$20 sps:$4 sm:$0xff]   ;;  %v1281_v7 = vld [vmem:[%s1561_s0 + $0xd8] ss:$20 sps:$4 sm:$0xff]   ;;  %v1284_v10 = vld [vmem:[%s1561_s0 + $0x88] ss:$20 sps:$4 sm:$0xff]  }
  0x1a   :  { %1098 = vmatprep.subr.bf16.mxu1 %v1219_v25  ;;  %v1285_v11 = vld [vmem:[%s1561_s0 + $0x128] ss:$20 sps:$4 sm:$0xff]  }
  0x1c   :  { %1035 = vmatpush3.bf16.msra.mxu0 %v1220_v26 }
  0x1d   :  { %1099 = vmatpush3.bf16.msra.mxu1 %v1221_v27  ;;  %1036 = vmatprep.subr.bf16.mxu0 %v1222_v28 }
  0x1e   :  { %1100 = vmatprep.subr.bf16.mxu1 %v1223_v29 }
  0x20   :  { %1037 = vmatpush3.bf16.msra.mxu0 %v1224_v30 }
  0x21   :  { %1101 = vmatpush3.bf16.msra.mxu1 %v1225_v31  ;;  %1162 = vmatprep.subr.bf16.mxu0 %v1232_v36 }
  0x22   :  { %1186 = vmatprep.subr.bf16.mxu1 %v1232_v36 }
  0x23   :  { %609 = vmatmul.mubr.bf16.vlgmr.msra.gmra.mxu0 %v1226_v32 }
  0x24   :  { %706 = vmatmul.mubr.bf16.vlgmr.msra.gmra.mxu1 %v1229_v34  ;;  %1163 = vmatpush3.bf16.msra.mxu0 %v1232_v36 }
  0x25   :  { %1190 = vmatpush3.bf16.msra.mxu1 %v1232_v36  ;;  %616 = vmatprep.mubr.bf16.mxu0 %v1233_v37 }
  0x26   :  { %713 = vmatprep.mubr.bf16.mxu1 %v1235_v38  ;;  %1164 = vmatprep.subr.bf16.mxu0 %v1245_v42 }
  0x27   :  { %1187 = vmatprep.subr.bf16.mxu1 %v1245_v42 }
  0x28   :  { %1165 = vmatpush3.bf16.msra.mxu0 %v1245_v42 }
  0x29   :  { %1191 = vmatpush3.bf16.msra.mxu1 %v1245_v42  ;;  %1166 = vmatprep.subr.bf16.mxu0 %v1258_v46 }
  0x2a   :  { %1188 = vmatprep.subr.bf16.mxu1 %v1258_v46 }
  0x2b   :  { %617 = vmatmul.mubr.bf16.gmra.mxu0 %v1237_v39 }
  0x2c   :  { %714 = vmatmul.mubr.bf16.gmra.mxu1 %v1238_v40  ;;  %624 = vmatprep.mubr.bf16.mxu0 %v1239_v41 }
  0x2d   :  { %721 = vmatprep.mubr.bf16.mxu1 %v1241_v43  ;;  %1167 = vmatpush3.bf16.msra.mxu0 %v1258_v46 }
  0x2e   :  { %1192 = vmatpush3.bf16.msra.mxu1 %v1258_v46  ;;  %1168 = vmatprep.subr.bf16.mxu0 %v1271_v49 }
  0x2f   :  { %1189 = vmatprep.subr.bf16.mxu1 %v1271_v49 }
  0x31   :  { %1169 = vmatpush3.bf16.msra.mxu0 %v1271_v49 }
  0x32   :  { %1193 = vmatpush3.bf16.msra.mxu1 %v1271_v49 }
  0x33   :  { %625 = vmatmul.mubr.bf16.gmra.mxu0 %v1243_v44 }
  0x34   :  { %722 = vmatmul.mubr.bf16.gmra.mxu1 %v1244_v45  ;;  %632 = vmatprep.mubr.bf16.mxu0 %v1246_v47 }
  0x35   :  { %729 = vmatprep.mubr.bf16.mxu1 %v1248_v48 }
  0x3b   :  { %633 = vmatmul.mubr.bf16.gmra.mxu0 %v1250_v50 }
  0x3c   :  { %730 = vmatmul.mubr.bf16.gmra.mxu1 %v1251_v51  ;;  %640 = vmatprep.mubr.bf16.mxu0 %v1252_v52 }
  0x3d   :  { %737 = vmatprep.mubr.bf16.mxu1 %v1254_v53 }
  0x43   :  { %641 = vmatmul.mubr.bf16.gmra.mxu0 %v1256_v54 }
  0x44   :  { %738 = vmatmul.mubr.bf16.gmra.mxu1 %v1257_v55  ;;  %648 = vmatprep.mubr.bf16.mxu0 %v1259_v56 }
  0x45   :  { %745 = vmatprep.mubr.bf16.mxu1 %v1261_v57 }
  0x4b   :  { %649 = vmatmul.mubr.bf16.gmra.mxu0 %v1263_v58 }
  0x4c   :  { %746 = vmatmul.mubr.bf16.gmra.mxu1 %v1264_v59  ;;  %656 = vmatprep.mubr.bf16.mxu0 %v1265_v60 }
  0x4d   :  { %753 = vmatprep.mubr.bf16.mxu1 %v1267_v61 }
  0x53   :  { %657 = vmatmul.mubr.bf16.gmra.mxu0 %v1269_v62 }
  0x54   :  { %754 = vmatmul.mubr.bf16.gmra.mxu1 %v1270_v63  ;;  %664 = vmatprep.mubr.bf16.mxu0 %v1272_v0 }
  0x55   :  { %761 = vmatprep.mubr.bf16.mxu1 %v1274_v1 }
  0x5b   :  { %665 = vmatmul.mubr.bf16.gmra.mxu0 %v1276_v2 }
  0x5c   :  { %762 = vmatmul.mubr.bf16.gmra.mxu1 %v1277_v3  ;;  %1170 = vmatprep.mubr.msk.bf16.mxu0 %vm551_vm0, %v1278_v4 }
  0x5d   :  { %1178 = vmatprep.mubr.msk.bf16.mxu1 %vm551_vm0, %v1279_v5 }
  0x63   :  { %1171 = vmatmul.mubr.msk.bf16.vlgmr.msra.gmra.mxu0 %vm551_vm0, %v1280_v6 }
  0x64   :  { %1179 = vmatmul.mubr.msk.bf16.vlgmr.msra.gmra.mxu1 %vm551_vm0, %v1281_v7  ;;  %1174 = vmatprep.mubr.msk.bf16.mxu0 %vm551_vm0, %v1282_v8 }
  0x65   :  { %1182 = vmatprep.mubr.msk.bf16.mxu1 %vm551_vm0, %v1283_v9 }
  0x6b   :  { %1175 = vmatmul.mubr.msk.bf16.gmra.mxu0 %vm551_vm0, %v1284_v10 }
  0x6c   :  { %1183 = vmatmul.mubr.msk.bf16.gmra.mxu1 %vm551_vm0, %v1285_v11 }
  0xe3   :  { %v1038_v12 = vpop.f32.mrf.mxu0 }
  0xe4   :  { %v1102_v13 = vpop.f32.mrf.mxu1 }
  0xe5   :  { %v1039_v14 = vpop.f32.mrf.mxu0 }
  0xe6   :  { %v1040_v15 = vadd.f32 %v1039_v14, %v1038_v12  ;;  %v1103_v16 = vpop.f32.mrf.mxu1 }
  0xe7   :  { %v1104_v17 = vadd.f32 %v1103_v16, %v1102_v13  ;;  %v1041_v18 = vpop.f32.mrf.mxu0 }
  0xe8   :  { %v1105_v19 = vpop.f32.mrf.mxu1 }
  0xe9   :  { %v1042_v20 = vpop.f32.mrf.mxu0  ;;  %v1542_v21 = vadd.f32 %v1104_v17, %v1040_v15 }
  0xea   :  { %v1043_v22 = vadd.f32 %v1042_v20, %v1041_v18  ;;  %v1106_v23 = vpop.f32.mrf.mxu1 }
  0xeb   :  { %1564 = vst [vmem:[#allocation2_spill] sm:$0xff] %v1542_v21  ;;  %v1107_v24 = vadd.f32 %v1106_v23, %v1105_v19  ;;  %v1044_v25 = vpop.f32.mrf.mxu0 }
  0xec   :  { %v1108_v26 = vpop.f32.mrf.mxu1 }
  0xed   :  { %v1045_v27 = vpop.f32.mrf.mxu0  ;;  %v1544_v28 = vadd.f32 %v1107_v24, %v1043_v22 }
  0xee   :  { %v1046_v29 = vadd.f32 %v1045_v27, %v1044_v25  ;;  %v1109_v30 = vpop.f32.mrf.mxu1 }
  0xef   :  { %1565 = vst [vmem:[#allocation3_spill] sm:$0xff] %v1544_v28  ;;  %v1110_v31 = vadd.f32 %v1109_v30, %v1108_v26  ;;  %v1047_v32 = vpop.f32.mrf.mxu0 }
  0xf0   :  { %v1111_v33 = vpop.f32.mrf.mxu1 }
  0xf1   :  { %v1048_v34 = vpop.f32.mrf.mxu0  ;;  %v1546_v35 = vadd.f32 %v1110_v31, %v1046_v29 }
  0xf2   :  { %v1112_v36 = vpop.f32.mrf.mxu1  ;;  %v1049_v22 = vadd.f32 %v1048_v34, %v1047_v32 }
  0xf3   :  { %1566 = vst [vmem:[#allocation4_spill] sm:$0xff] %v1546_v35  ;;  %v1050_v37 = vpop.f32.mrf.mxu0  ;;  %v1113_v23 = vadd.f32 %v1112_v36, %v1111_v33 }
  0xf4   :  { %v1114_v38 = vpop.f32.mrf.mxu1 }
  0xf5   :  { %v1051_v39 = vpop.f32.mrf.mxu0 }
  0xf6   :  { %v1115_v40 = vpop.f32.mrf.mxu1  ;;  %v1052_v24 = vadd.f32 %v1051_v39, %v1050_v37 }
  0xf7   :  { %v1053_v41 = vpop.f32.mrf.mxu0  ;;  %v1116_v25 = vadd.f32 %v1115_v40, %v1114_v38 }
  0xf8   :  { %v1117_v42 = vpop.f32.mrf.mxu1 }
  0xf9   :  { %v1054_v43 = vpop.f32.mrf.mxu0 }
  0xfa   :  { %v1118_v44 = vpop.f32.mrf.mxu1  ;;  %v1055_v27 = vadd.f32 %v1054_v43, %v1053_v41  ;;  %v719_v43 = vadd.f32 %v1113_v23, %v1049_v22 }
  0xfb   :  { %v1056_v45 = vpop.f32.mrf.mxu0  ;;  %v1119_v29 = vadd.f32 %v1118_v44, %v1117_v42 }
  0xfc   :  { %v1120_v46 = vpop.f32.mrf.mxu1 }
  0xfd   :  { %v1057_v47 = vpop.f32.mrf.mxu0 }
  0xfe   :  { %v1121_v48 = vpop.f32.mrf.mxu1  ;;  %v1058_v30 = vadd.f32 %v1057_v47, %v1056_v45  ;;  %v724_v45 = vadd.f32 %v1116_v25, %v1052_v24  ;;  %v727_v47 = vadd.f32 %v1119_v29, %v1055_v27 }
  0xff   :  { %v1059_v49 = vpop.f32.mrf.mxu0  ;;  %v1122_v31 = vadd.f32 %v1121_v48, %v1120_v46 }
 0x100   :  { %v1123_v50 = vpop.f32.mrf.mxu1 }
 0x101   :  { %v1060_v51 = vpop.f32.mrf.mxu0  ;;  %v732_v44 = vadd.f32 %v1122_v31, %v1058_v30  ;;  %v1002_v31 = vld [vmem:[%s1562_s2] ss:$0 sm:$0xff] }
 0x102   :  { %v1124_v52 = vpop.f32.mrf.mxu1  ;;  %v1061_v35 = vadd.f32 %v1060_v51, %v1059_v49 }
 0x103   :  { %v1062_v53 = vpop.f32.mrf.mxu0  ;;  %v1125_v32 = vadd.f32 %v1124_v52, %v1123_v50 }
 0x104   :  { %v1126_v54 = vpop.f32.mrf.mxu1 }
 0x105   :  { %v1063_v55 = vpop.f32.mrf.mxu0 }
 0x106   :  { %v1127_v56 = vpop.f32.mrf.mxu1  ;;  %v1064_v34 = vadd.f32 %v1063_v55, %v1062_v53 }
 0x107   :  { %v1065_v57 = vpop.f32.mrf.mxu0  ;;  %v1128_v33 = vadd.f32 %v1127_v56, %v1126_v54  ;;  %v735_v56 = vadd.f32 %v1125_v32, %v1061_v35 }
 0x108   :  { %v1129_v58 = vpop.f32.mrf.mxu1 }
 0x109   :  { %v1066_v59 = vpop.f32.mrf.mxu0  ;;  %v740_v55 = vadd.f32 %v1128_v33, %v1064_v34 }
 0x10a   :  { %v1130_v60 = vpop.f32.mrf.mxu1  ;;  %v1067_v46 = vadd.f32 %v1066_v59, %v1065_v57 }
 0x10b   :  { %v1068_v61 = vpop.f32.mrf.mxu0  ;;  %v1131_v48 = vadd.f32 %v1130_v60, %v1129_v58 }
 0x10c   :  { %v1132_v62 = vpop.f32.mrf.mxu1 }
 0x10d   :  { %v1069_v63 = vpop.f32.mrf.mxu0  ;;  %v743_v59 = vadd.f32 %v1131_v48, %v1067_v46 }
 0x10e   :  { %v1133_v0 = vpop.f32.mrf.mxu1  ;;  %v1070_v37 = vadd.f32 %v1069_v63, %v1068_v61 }
 0x10f   :  { %v1071_v1 = vpop.f32.mrf.mxu0  ;;  %v1134_v39 = vadd.f32 %v1133_v0, %v1132_v62 }
 0x110   :  { %v1135_v2 = vpop.f32.mrf.mxu1 }
 0x111   :  { %v1072_v3 = vpop.f32.mrf.mxu0  ;;  %v748_v63 = vadd.f32 %v1134_v39, %v1070_v37 }
 0x112   :  { %v1136_v4 = vpop.f32.mrf.mxu1  ;;  %v1073_v52 = vadd.f32 %v1072_v3, %v1071_v1 }
 0x113   :  { %v1074_v5 = vpop.f32.mrf.mxu0  ;;  %v1137_v53 = vadd.f32 %v1136_v4, %v1135_v2  ;;  %v1568_v2 = vld [vmem:[#allocation2_spill] sm:$0xff] }
 0x114   :  { %v1138_v6 = vpop.f32.mrf.mxu1 }
 0x115   :  { %v1075_v7 = vpop.f32.mrf.mxu0  ;;  %v751_v4 = vadd.f32 %v1137_v53, %v1073_v52 }
 0x116   :  { %v1139_v8 = vpop.f32.mrf.mxu1  ;;  %v1076_v49 = vadd.f32 %v1075_v7, %v1074_v5 }
 0x117   :  { %v1077_v9 = vpop.f32.mrf.mxu0  ;;  %v1140_v51 = vadd.f32 %v1139_v8, %v1138_v6 }
 0x118   :  { %v1141_v10 = vpop.f32.mrf.mxu1 }
 0x119   :  { %v1078_v11 = vpop.f32.mrf.mxu0  ;;  %v756_v1 = vadd.f32 %v1140_v51, %v1076_v49 }
 0x11a   :  { %v1142_v12 = vpop.f32.mrf.mxu1 }
 0x11b   :  { %v1080_v13 = vpop.f32.mrf.mxu0 }
 0x11c   :  { %v1144_v14 = vpop.f32.mrf.mxu1 }
 0x11d   :  { %v1081_v15 = vpop.f32.mrf.mxu0 }
 0x11e   :  { %v1145_v16 = vpop.f32.mrf.mxu1  ;;  %v1082_v38 = vadd.f32 %v1081_v15, %v1080_v13  ;;  %v1143_v15 = vadd.f32 %v1142_v12, %v1141_v10 }
 0x11f   :  { %v1083_v17 = vpop.f32.mrf.mxu0  ;;  %v1146_v40 = vadd.f32 %v1145_v16, %v1144_v14  ;;  %v1079_v14 = vadd.f32 %v1078_v11, %v1077_v9  ;;  %v1567_v16 = vld [vmem:[#allocation4_spill] sm:$0xff] }
 0x120   :  { %v1147_v18 = vpop.f32.mrf.mxu1 }
 0x121   :  { %v1084_v19 = vpop.f32.mrf.mxu0  ;;  %v764_v13 = vadd.f32 %v1146_v40, %v1082_v38 }
 0x122   :  { %v1148_v20 = vpop.f32.mrf.mxu1  ;;  %v1085_v61 = vadd.f32 %v1084_v19, %v1083_v17 }
 0x123   :  { %v1172_v26 = vpop.f32.mrf.mxu0  ;;  %v1149_v62 = vadd.f32 %v1148_v20, %v1147_v18 }
 0x124   :  { %v1180_v28 = vpop.f32.mrf.mxu1  ;;  %v813_v22 = vadd.f32 %v1172_v26, %v1567_v16 }
 0x125   :  { %v804_v21 = vpop.f32.mrf.mxu0  ;;  %v845_v58 = vadd.f32 %v1180_v28, %v748_v63  ;;  %v767_v10 = vadd.f32 %v1149_v62, %v1085_v61  ;;  %v759_v28 = vadd.f32 %v1143_v15, %v1079_v14 }
 0x126   :  { %v836_v36 = vpop.f32.mrf.mxu1  ;;  %v805_v3 = vadd.f32 %v804_v21, %v1568_v2  ;;  %v1569_v21 = vld [vmem:[#allocation3_spill] sm:$0xff] }
 0x127   :  { %v1173_v41 = vpop.f32.mrf.mxu0  ;;  %v837_v8 = vadd.f32 %v836_v36, %v740_v55 }
 0x128   :  { %v1181_v42 = vpop.f32.mrf.mxu1  ;;  %v816_v11 = vadd.f32 %v1173_v41, %v719_v43 }
 0x129   :  { %v807_v50 = vpop.f32.mrf.mxu0  ;;  %v848_v24 = vadd.f32 %v1181_v42, %v751_v4 }
 0x12a   :  { %v839_v54 = vpop.f32.mrf.mxu1  ;;  %v808_v30 = vadd.f32 %v807_v50, %v1569_v21 }
 0x12b   :  { %v1176_v0 = vpop.f32.mrf.mxu0  ;;  %v840_v36 = vadd.f32 %v839_v54, %v743_v59 }
 0x12c   :  { %v829_v23 = vadd.f32 %v1176_v0, %v732_v44  ;;  %v1184_v57 = vpop.f32.mrf.mxu1 }
 0x12d   :  { %v861_v60 = vadd.f32 %v1184_v57, %v764_v13  ;;  %v820_v5 = vpop.f32.mrf.mxu0 }
 0x12e   :  { %v869_v35 = vmax.f32 %v813_v22, %v829_v23  ;;  %v821_v6 = vadd.f32 %v820_v5, %v724_v45  ;;  %v852_v7 = vpop.f32.mrf.mxu1 }
 0x12f   :  { %v873_v17 = vmax.f32 %v845_v58, %v861_v60  ;;  %v853_v18 = vadd.f32 %v852_v7, %v756_v1  ;;  %v1177_v9 = vpop.f32.mrf.mxu0 }
 0x130   :  { %v867_v12 = vmax.f32 %v805_v3, %v821_v6  ;;  %v832_v19 = vadd.f32 %v1177_v9, %v735_v56  ;;  %v1185_v20 = vpop.f32.mrf.mxu1 }
 0x131   :  { %v877_v25 = vmax.f32 %v869_v35, %v873_v17  ;;  %v871_v26 = vmax.f32 %v837_v8, %v853_v18  ;;  %v864_v27 = vadd.f32 %v1185_v20, %v767_v10  ;;  %v823_v29 = vpop.f32.mrf.mxu0 }
 0x132   :  { %v870_v32 = vmax.f32 %v816_v11, %v832_v19  ;;  %v824_v34 = vadd.f32 %v823_v29, %v727_v47  ;;  %v855_v33 = vpop.f32.mrf.mxu1 }
 0x133   :  { %v875_v37 = vmax.f32 %v867_v12, %v871_v26  ;;  %v874_v39 = vmax.f32 %v848_v24, %v864_v27  ;;  %v856_v38 = vadd.f32 %v855_v33, %v759_v28  ;;  %v888_v41 = vadd.f32 %v1002_v31, %v877_v25 }
 0x134   :  { %v868_v40 = vmax.f32 %v808_v30, %v824_v34 }
 0x135   :  { %v878_v43 = vmax.f32 %v870_v32, %v874_v39  ;;  %v872_v42 = vmax.f32 %v840_v36, %v856_v38  ;;  %v886_v44 = vadd.f32 %v1002_v31, %v875_v37  ;;  %v892_v48 = vmax.f32 %v888_v41, 0.0 }
 0x137   :  { %v889_v45 = vadd.f32 %v1002_v31, %v878_v43  ;;  %v876_v46 = vmax.f32 %v868_v40, %v872_v42  ;;  %v890_v50 = vmax.f32 %v886_v44, 0.0 }
 0x139   :  { %v893_v49 = vmax.f32 %v889_v45, 0.0  ;;  %v887_v51 = vadd.f32 %v1002_v31, %v876_v46 }
 0x13b   :  { %v1019_v52 = vpack.c.bf16 %v893_v49, %v892_v48  ;;  %v891_v53 = vmax.f32 %v887_v51, 0.0 }
 0x13d   :  { %1021 = vst [vmem:[%s1563_s3 + $0x8] sm:$0xff] %v1019_v52   ;;  %v1014_v47 = vpack.c.bf16 %v891_v53, %v890_v50 }
 0x13f   :  { %1015 = vst [vmem:[%s1563_s3] sm:$0xff] %v1014_v47  }

// kernel: custom_cnn_forward.5
= control target key start
LH: loop header
LB: loop body
LE: loop exit
PB: predicated region body
PF: predicated region fallthrough
CT: control target
= control target key end

     0   :  { %10 = vsyncpa [#allocation4], 0  ;;  %s1341_s18 = smov 0   ;;  %s1510_s0 = inlined_call_operand.vmem [shape: bf16[2,2048], index: 0, kind: input, shape index: {}]   ;;  %s1511_s1 = inlined_call_operand.vmem [shape: bf16[2048,256], index: 1, kind: input, shape index: {}]   ;;  %s1512_s2 = inlined_call_operand.vmem [shape: f32[1,256], index: 2, kind: input, shape index: {}]   ;;  %s1513_s3 = inlined_call_operand.vmem [shape: bf16[256,2], index: 3, kind: input, shape index: {}]   ;;  %s1514_s4 = inlined_call_operand.vmem [shape: f32[1,2], index: 4, kind: input, shape index: {}]   ;;  %s1515_s5 = inlined_call_operand.hbm [shape: f32[2,2], index: 5, kind: output, shape index: {}]  }
   0x1 LB: > { %s1347_s19 = sadd.s32 4294967295, %s1305_s18   ;;  %p1025_p0 = scmp.ge.s32.totalorder %s1305_s18, 1  ;;  %s1305_s18 = sphi %s1341_s18, %s16_s18  }
   0x2   : > { %p195_p1 = scmp.lt.s32.totalorder %s1305_s18, 5 }
   0x4   : > { %p196_p2 = pnand %p1025_p0, %p195_p1 }
   0x5   : > { %s1026_s20 = sshll.u32 (!%p196_p2), %s1347_s19, 2  ;;  %s1027_s21 = sshll.u32 (!%p196_p2), %s1347_s19, 6 }
   0x6   : > { %199 = sbr.rel (%p196_p2) target bundleno = 538 (0x21a), region = 40  ;;  %p224_p3 = scmp.lt.s32.totalorder (!%p196_p2), %s1026_s20, 15 }
   0x7   : > { %p229_p4 = scmp.lt.s32.totalorder (!%p196_p2), %s1027_s21, 255  ;;  %p1030_p5 = scmp.ne.s32.totalorder (!%p196_p2), %s1347_s19, 0 }
   0xb   : > { %s1517_s20 = smov (!%p224_p3, %s1026_s20), 15  ;;  %s1519_s21 = smov (!%p229_p4, %s1027_s21), 255 }
   0xc   : > { %s226_s24 = scalar_lea.vmem %s1510_s0, %s1517_s20  ;;  %s1118_s25 = sshll.u32 %s1519_s21, 3 }
   0xd   : > { %s1362_s28 = scalar_lea.vmem %s1511_s1, %s1118_s25  ;;  %239 = sbr.rel (%p1030_p5) target bundleno = 20 (0x14), region = 44 }
  0x12   : > { %v1307_v0 = vmov 0.0  }
  0x13   : > { %240 = vst [vmem:[#allocation2] sm:$0xf] %v1307_v0 }
  0x14 PF: > { %v1159_v1 = vld [vmem:[%s1362_s28 + $0x74] ss:$8 sps:$4 sm:$0xff]   ;;  %v1163_v3 = vld [vmem:[%s1362_s28 + $0x70] ss:$8 sps:$4 sm:$0xff]   ;;  %v1165_v5 = vld [vmem:[%s1362_s28 + $0x64] ss:$8 sps:$4 sm:$0xff]   ;;  %v319_v41 = vlaneseq }
  0x15   : > { %v1161_v2 = vld [vmem:[%s1362_s28 + $0x174] ss:$8 sps:$4 sm:$0xff]   ;;  %656 = vmatprep.subr.bf16.mxu0 %v1159_v1  ;;  %v1164_v4 = vld [vmem:[%s1362_s28 + $0x170] ss:$8 sps:$4 sm:$0xff]   ;;  %v1167_v6 = vld [vmem:[%s1362_s28 + $0x164] ss:$8 sps:$4 sm:$0xff]  }
  0x16   : > { %697 = vmatprep.subr.bf16.mxu1 %v1161_v2  ;;  %657 = vmatpush1.bf16.msra.mxu0 %v1163_v3  ;;  %v1169_v7 = vld [vmem:[%s1362_s28 + $0x60] ss:$8 sps:$4 sm:$0xff]   ;;  %v1171_v9 = vld [vmem:[%s1362_s28 + $0x54] ss:$8 sps:$4 sm:$0xff]   ;;  %v1175_v11 = vld [vmem:[%s1362_s28 + $0x50] ss:$8 sps:$4 sm:$0xff]  }
  0x17   : > { %698 = vmatpush1.bf16.msra.mxu1 %v1164_v4  ;;  %658 = vmatprep.subr.bf16.mxu0 %v1165_v5  ;;  %v1170_v8 = vld [vmem:[%s1362_s28 + $0x160] ss:$8 sps:$4 sm:$0xff]   ;;  %v1173_v10 = vld [vmem:[%s1362_s28 + $0x154] ss:$8 sps:$4 sm:$0xff]   ;;  %v1176_v12 = vld [vmem:[%s1362_s28 + $0x150] ss:$8 sps:$4 sm:$0xff]  }
  0x18   : > { %699 = vmatprep.subr.bf16.mxu1 %v1167_v6  ;;  %v1177_v13 = vld [vmem:[%s1362_s28 + $0x44] ss:$8 sps:$4 sm:$0xff]   ;;  %v1181_v15 = vld [vmem:[%s1362_s28 + $0x40] ss:$8 sps:$4 sm:$0xff]   ;;  %v1183_v17 = vld [vmem:[%s1362_s28 + $0x34] ss:$8 sps:$4 sm:$0xff]  }
  0x19   : > { %v1179_v14 = vld [vmem:[%s1362_s28 + $0x144] ss:$8 sps:$4 sm:$0xff]   ;;  %v1182_v16 = vld [vmem:[%s1362_s28 + $0x140] ss:$8 sps:$4 sm:$0xff]   ;;  %v1185_v18 = vld [vmem:[%s1362_s28 + $0x134] ss:$8 sps:$4 sm:$0xff]  }
  0x1a   : > { %659 = vmatpush1.bf16.msra.mxu0 %v1169_v7  ;;  %v1187_v19 = vld [vmem:[%s1362_s28 + $0x30] ss:$8 sps:$4 sm:$0xff]   ;;  %v1189_v21 = vld [vmem:[%s1362_s28 + $0x24] ss:$8 sps:$4 sm:$0xff]   ;;  %v1193_v23 = vld [vmem:[%s1362_s28 + $0x20] ss:$8 sps:$4 sm:$0xff]  }
  0x1b   : > { %700 = vmatpush1.bf16.msra.mxu1 %v1170_v8  ;;  %660 = vmatprep.subr.bf16.mxu0 %v1171_v9  ;;  %v1188_v20 = vld [vmem:[%s1362_s28 + $0x130] ss:$8 sps:$4 sm:$0xff]   ;;  %v1191_v22 = vld [vmem:[%s1362_s28 + $0x124] ss:$8 sps:$4 sm:$0xff]   ;;  %v1194_v24 = vld [vmem:[%s1362_s28 + $0x120] ss:$8 sps:$4 sm:$0xff]  }
  0x1c   : > { %701 = vmatprep.subr.bf16.mxu1 %v1173_v10  ;;  %v1195_v25 = vld [vmem:[%s1362_s28 + $0x14] ss:$8 sps:$4 sm:$0xff]   ;;  %v1199_v27 = vld [vmem:[%s1362_s28 + $0x10] ss:$8 sps:$4 sm:$0xff]   ;;  %v1201_v29 = vld [vmem:[%s1362_s28 + $0x4] ss:$8 sps:$4 sm:$0xff]  }
  0x1d   : > { %v1197_v26 = vld [vmem:[%s1362_s28 + $0x114] ss:$8 sps:$4 sm:$0xff]   ;;  %v1200_v28 = vld [vmem:[%s1362_s28 + $0x110] ss:$8 sps:$4 sm:$0xff]   ;;  %v1203_v30 = vld [vmem:[%s1362_s28 + $0x104] ss:$8 sps:$4 sm:$0xff]  }
  0x1e   : > { %661 = vmatpush1.bf16.msra.mxu0 %v1175_v11  ;;  %v1205_v31 = vld [vmem:[%s1362_s28] ss:$8 sps:$4 sm:$0xff]   ;;  %v1207_v33 = vld [vmem:[%s1362_s28 + $0xf4] ss:$8 sps:$4 sm:$0xff]   ;;  %v1211_v35 = vld [vmem:[%s1362_s28 + $0xf0] ss:$8 sps:$4 sm:$0xff]  }
  0x1f   : > { %702 = vmatpush1.bf16.msra.mxu1 %v1176_v12  ;;  %662 = vmatprep.subr.bf16.mxu0 %v1177_v13  ;;  %v1206_v32 = vld [vmem:[%s1362_s28 + $0x100] ss:$8 sps:$4 sm:$0xff]   ;;  %v1209_v34 = vld [vmem:[%s1362_s28 + $0x1f4] ss:$8 sps:$4 sm:$0xff]   ;;  %v1212_v36 = vld [vmem:[%s1362_s28 + $0x1f0] ss:$8 sps:$4 sm:$0xff]  }
  0x20   : > { %703 = vmatprep.subr.bf16.mxu1 %v1179_v14  ;;  %v1213_v37 = vld [vmem:[%s1362_s28 + $0xe4] ss:$8 sps:$4 sm:$0xff]   ;;  %v1308_v39 = vmov 1966171168   ;;  %v1217_v42 = vld [vmem:[%s1362_s28 + $0xe0] ss:$8 sps:$4 sm:$0xff]  }
  0x21   : > { %v1215_v38 = vld [vmem:[%s1362_s28 + $0x1e4] ss:$8 sps:$4 sm:$0xff]   ;;  %v317_v40 = vunpack.c.l.s4 %v1308_v39  ;;  %v1218_v43 = vld [vmem:[%s1362_s28 + $0x1e0] ss:$8 sps:$4 sm:$0xff]   ;;  %v1219_v44 = vld [vmem:[%s1362_s28 + $0xd4] ss:$8 sps:$4 sm:$0xff]  }
  0x22   : > { %663 = vmatpush1.bf16.msra.mxu0 %v1181_v15  ;;  %v1221_v45 = vld [vmem:[%s1362_s28 + $0x1d4] ss:$8 sps:$4 sm:$0xff]   ;;  %v1407_v47 = vshrl.u32 %v319_v41, 7  ;;  %v1223_v48 = vld [vmem:[%s1362_s28 + $0xd0] ss:$8 sps:$4 sm:$0xff]   ;;  %p1096_p6 = scmp.ne.s32.totalorder %s1347_s19, 3 }
  0x23   : > { %704 = vmatpush1.bf16.msra.mxu1 %v1182_v16  ;;  %664 = vmatprep.subr.bf16.mxu0 %v1183_v17  ;;  %v318_v46 = vunpack.c.0.s8 %v317_v40  ;;  %v1224_v49 = vld [vmem:[%s1362_s28 + $0x1d0] ss:$8 sps:$4 sm:$0xff]   ;;  %v1225_v50 = vld [vmem:[%s1362_s28 + $0xc4] ss:$8 sps:$4 sm:$0xff]   ;;  %v1229_v54 = vld [vmem:[%s1362_s28 + $0xc0] ss:$8 sps:$4 sm:$0xff]  }
  0x24   : > { %705 = vmatprep.subr.bf16.mxu1 %v1185_v18  ;;  %v1227_v51 = vld [vmem:[%s1362_s28 + $0x1c4] ss:$8 sps:$4 sm:$0xff]   ;;  %v1031_v53 = vld.sshfl [vmem:[%s226_s24] sm:$0x33 pattern:$0x75316420] }
  0x25   : > { %v321_v52 = vsub.s32 %v318_v46, %v1407_v47  ;;  %v1230_v55 = vld [vmem:[%s1362_s28 + $0x1c0] ss:$8 sps:$4 sm:$0xff]   ;;  %v315_v56 = vcombine.high %v1031_v53, %v1031_v53  ;;  %v1231_v57 = vld [vmem:[%s1362_s28 + $0xb4] ss:$8 sps:$4 sm:$0xff]   ;;  %v1235_v60 = vld [vmem:[%s1362_s28 + $0xb0] ss:$8 sps:$4 sm:$0xff]  }
  0x26   : > { %665 = vmatpush1.bf16.msra.mxu0 %v1187_v19  ;;  %v1233_v58 = vld [vmem:[%s1362_s28 + $0x1b4] ss:$8 sps:$4 sm:$0xff]   ;;  %v1236_v61 = vld [vmem:[%s1362_s28 + $0x1b0] ss:$8 sps:$4 sm:$0xff]   ;;  %v1237_v63 = vld [vmem:[%s1362_s28 + $0xa4] ss:$8 sps:$4 sm:$0xff]  }
  0x27   : > { %706 = vmatpush1.bf16.msra.mxu1 %v1188_v20  ;;  %666 = vmatprep.subr.bf16.mxu0 %v1189_v21  ;;  %v329_v59 = vrot.slane %v315_v56, %v321_v52  ;;  %v1239_v0 = vld [vmem:[%s1362_s28 + $0x1a4] ss:$8 sps:$4 sm:$0xff]   ;;  %v1241_v1 = vld [vmem:[%s1362_s28 + $0xa0] ss:$8 sps:$4 sm:$0xff]   ;;  %v1243_v3 = vld [vmem:[%s1362_s28 + $0x94] ss:$8 sps:$4 sm:$0xff]   ;;  %v322_v9 = vrot.slane %v1031_v53, %v321_v52 }
  0x28   : > { %707 = vmatprep.subr.bf16.mxu1 %v1191_v22  ;;  %v1242_v2 = vld [vmem:[%s1362_s28 + $0x1a0] ss:$8 sps:$4 sm:$0xff]   ;;  %v1245_v4 = vld [vmem:[%s1362_s28 + $0x194] ss:$8 sps:$4 sm:$0xff]   ;;  %v1247_v5 = vld [vmem:[%s1362_s28 + $0x90] ss:$8 sps:$4 sm:$0xff]  }
  0x29   : > { %v331_v62 = vcombine.high %v329_v59, %v329_v59  ;;  %688 = vmatprep.mubr.bf16.mxu0 %v329_v59  ;;  %v1248_v6 = vld [vmem:[%s1362_s28 + $0x190] ss:$8 sps:$4 sm:$0xff]   ;;  %v1249_v7 = vld [vmem:[%s1362_s28 + $0x84] ss:$8 sps:$4 sm:$0xff]   ;;  %v1253_v10 = vld [vmem:[%s1362_s28 + $0x80] ss:$8 sps:$4 sm:$0xff]   ;;  %v330_v12 = vcombine.high %v322_v9, %v322_v9 }
  0x2a   : > { %667 = vmatpush1.bf16.msra.mxu0 %v1193_v23  ;;  %v1251_v8 = vld [vmem:[%s1362_s28 + $0x184] ss:$8 sps:$4 sm:$0xff]   ;;  %v1254_v11 = vld [vmem:[%s1362_s28 + $0x180] ss:$8 sps:$4 sm:$0xff]   ;;  %v1309_v13 = vmov 1983009808  }
  0x2b   : > { %708 = vmatpush1.bf16.msra.mxu1 %v1194_v24  ;;  %668 = vmatprep.subr.bf16.mxu0 %v1195_v25  ;;  %v742_v14 = vunpack.c.l.s4 %v1309_v13 }
  0x2c   : > { %709 = vmatprep.subr.bf16.mxu1 %v1197_v26  ;;  %729 = vmatprep.mubr.bf16.mxu1 %v331_v62  ;;  %v241_v26 = vld [vmem:[#allocation2] sm:$0xf] }
  0x2d   : > { %v743_v15 = vunpack.c.0.s8 %v742_v14 }
  0x2e   : > { %669 = vmatpush1.bf16.msra.mxu0 %v1199_v27 }
  0x2f   : > { %710 = vmatpush1.bf16.msra.mxu1 %v1200_v28  ;;  %670 = vmatprep.subr.bf16.mxu0 %v1201_v29  ;;  %v746_v22 = vsub.s32 %v743_v15, %v1407_v47 }
  0x30   : > { %711 = vmatprep.subr.bf16.mxu1 %v1203_v30 }
  0x32   : > { %671 = vmatpush1.bf16.msra.mxu0 %v1205_v31 }
  0x33   : > { %712 = vmatpush1.bf16.msra.mxu1 %v1206_v32  ;;  %672 = vmatprep.subr.bf16.mxu0 %v1207_v33 }
  0x34   : > { %713 = vmatprep.subr.bf16.mxu1 %v1209_v34 }
  0x36   : > { %673 = vmatpush2.bf16.msra.mxu0 %v1211_v35 }
  0x37   : > { %714 = vmatpush2.bf16.msra.mxu1 %v1212_v36  ;;  %674 = vmatprep.subr.bf16.mxu0 %v1213_v37 }
  0x38   : > { %715 = vmatprep.subr.bf16.mxu1 %v1215_v38 }
  0x3a   : > { %675 = vmatpush2.bf16.msra.mxu0 %v1217_v42 }
  0x3b   : > { %716 = vmatpush2.bf16.msra.mxu1 %v1218_v43  ;;  %676 = vmatprep.subr.bf16.mxu0 %v1219_v44 }
  0x3c   : > { %717 = vmatprep.subr.bf16.mxu1 %v1221_v45 }
  0x3e   : > { %677 = vmatpush2.bf16.msra.mxu0 %v1223_v48 }
  0x3f   : > { %718 = vmatpush2.bf16.msra.mxu1 %v1224_v49  ;;  %678 = vmatprep.subr.bf16.mxu0 %v1225_v50 }
  0x40   : > { %719 = vmatprep.subr.bf16.mxu1 %v1227_v51 }
  0x42   : > { %679 = vmatpush2.bf16.msra.mxu0 %v1229_v54 }
  0x43   : > { %720 = vmatpush2.bf16.msra.mxu1 %v1230_v55  ;;  %680 = vmatprep.subr.bf16.mxu0 %v1231_v57 }
  0x44   : > { %721 = vmatprep.subr.bf16.mxu1 %v1233_v58 }
  0x46   : > { %681 = vmatpush2.bf16.msra.mxu0 %v1235_v60 }
  0x47   : > { %722 = vmatpush2.bf16.msra.mxu1 %v1236_v61  ;;  %682 = vmatprep.subr.bf16.mxu0 %v1237_v63 }
  0x48   : > { %723 = vmatprep.subr.bf16.mxu1 %v1239_v0 }
  0x4a   : > { %683 = vmatpush2.bf16.msra.mxu0 %v1241_v1 }
  0x4b   : > { %724 = vmatpush2.bf16.msra.mxu1 %v1242_v2  ;;  %684 = vmatprep.subr.bf16.mxu0 %v1243_v3 }
  0x4c   : > { %725 = vmatprep.subr.bf16.mxu1 %v1245_v4 }
  0x4e   : > { %685 = vmatpush2.bf16.msra.mxu0 %v1247_v5 }
  0x4f   : > { %726 = vmatpush2.bf16.msra.mxu1 %v1248_v6  ;;  %686 = vmatprep.subr.bf16.mxu0 %v1249_v7 }
  0x50   : > { %727 = vmatprep.subr.bf16.mxu1 %v1251_v8 }
  0x52   : > { %687 = vmatpush2.bf16.msra.mxu0 %v1253_v10 }
  0x53   : > { %728 = vmatpush2.bf16.msra.mxu1 %v1254_v11 }
  0x55   : > { %689 = vmatmul.mubr.bf16.vlgmr.msra.gmra.mxu0 %v322_v9 }
  0x56   : > { %730 = vmatmul.mubr.bf16.vlgmr.msra.gmra.mxu1 %v330_v12 }
 0x115   : > { %v690_v16 = vpop.f32.mrf.mxu0 }
 0x116   : > { %v731_v17 = vpop.f32.mrf.mxu1 }
 0x117   : > { %v692_v18 = vpop.f32.mrf.mxu0  ;;  %v732_v20 = vadd.f32 %v731_v17, %v690_v16 }
 0x118   : > { %v733_v19 = vpop.f32.mrf.mxu1 }
 0x119   : > { %v734_v21 = vadd.f32 %v733_v19, %v692_v18  ;;  %v694_v23 = vpop.f32.mrf.mxu0 }
 0x11a   : > { %v735_v24 = vpop.f32.mrf.mxu1 }
 0x11b   : > { %v740_v25 = vcombine.low %v732_v20, %v734_v21  ;;  %v695_v27 = vpop.f32.mrf.mxu0 }
 0x11c   : > { %v736_v28 = vpop.f32.mrf.mxu1 }
 0x11d   : > { %v747_v29 = vrot.slane %v740_v25, %v746_v22  ;;  %754 = sbr.rel (%p1096_p6) target bundleno = 523 (0x20b), region = 48 }
 0x11f   : > { %v749_v30 = vadd.f32 %v747_v29, %v241_v26 }
 0x121   : > { %750 = vst [vmem:[#allocation2] sm:$0xf] %v749_v30 }
 0x122   : > { %v1255_v31 = vld [vmem:[%s1513_s3 + $0x78] sm:$0xff]   ;;  %v1257_v33 = vld [vmem:[%s1513_s3 + $0x70] sm:$0xff]   ;;  %v1259_v35 = vld [vmem:[%s1513_s3 + $0x68] sm:$0xff]   ;;  %v760_v40 = vsub.s32 0, %v1407_v47  ;;  %v764_v41 = vsub.s32 1, %v1407_v47  ;;  %vm965_vm0 = vcmask 9216  }
 0x123   : > { %v1256_v32 = vld [vmem:[%s1513_s3 + $0x38] sm:$0xff]   ;;  %1119 = vmatprep.subr.bf16.mxu0 %v1255_v31  ;;  %v1258_v34 = vld [vmem:[%s1513_s3 + $0x30] sm:$0xff]   ;;  %v1260_v36 = vld [vmem:[%s1513_s3 + $0x28] sm:$0xff]  }
 0x124   : > { %1120 = vmatpush3.bf16.msra.mxu0 %v1256_v32  ;;  %v1261_v37 = vld [vmem:[%s1513_s3 + $0x60] sm:$0xff]   ;;  %v1263_v39 = vld [vmem:[%s1513_s3 + $0x58] sm:$0xff]   ;;  %v1265_v43 = vld [vmem:[%s1513_s3 + $0x50] sm:$0xff]  }
 0x125   : > { %1121 = vmatprep.subr.bf16.mxu0 %v1257_v33  ;;  %v1262_v38 = vld [vmem:[%s1513_s3 + $0x20] sm:$0xff]   ;;  %v1264_v42 = vld [vmem:[%s1513_s3 + $0x18] sm:$0xff]   ;;  %v1266_v47 = vld [vmem:[%s1513_s3 + $0x10] sm:$0xff]  }
 0x126   : > { %v756_v44 = vld [vmem:[%s1512_s2] sm:$0x3]  ;;  %v1267_v49 = vld [vmem:[%s1513_s3 + $0x48] sm:$0xff]  }
 0x127   : > { %v761_v45 = vrot.slane %v756_v44, %v760_v40  ;;  %v765_v46 = vrot.slane %v756_v44, %v764_v41  ;;  %v1268_v52 = vld [vmem:[%s1513_s3 + $0x8] sm:$0xff]   ;;  %v1269_v54 = vld [vmem:[%s1513_s3 + $0x40] sm:$0xff]  }
 0x128   : > { %1122 = vmatpush3.bf16.msra.mxu0 %v1258_v34  ;;  %v755_v50 = vld [vmem:[#allocation2] sm:$0xf] }
 0x129   : > { %1123 = vmatprep.subr.bf16.mxu0 %v1259_v35  ;;  %v766_v48 = vcombine.low %v761_v45, %v765_v46  ;;  %v1270_v56 = vld [vmem:[%s1513_s3] sm:$0xff]  }
 0x12a   : > { %v1097_v62 = vld [vmem:[%s1514_s4] ss:$0 sm:$0xff] }
 0x12b   : > { %v773_v51 = vrot.slane %v766_v48, %v746_v22 }
 0x12c   : > { %1124 = vmatpush3.bf16.msra.mxu0 %v1260_v36 }
 0x12d   : > { %1125 = vmatprep.subr.bf16.mxu0 %v1261_v37  ;;  %v775_v53 = vadd.f32 %v773_v51, %v755_v50 }
 0x12f   : > { %v776_v55 = vmax.f32 %v775_v53, 0.0 }
 0x130   : > { %1126 = vmatpush3.bf16.msra.mxu0 %v1262_v38 }
 0x131   : > { %1127 = vmatprep.subr.bf16.mxu0 %v1263_v39  ;;  %v784_v57 = vrot.slane %v776_v55, %v746_v22 }
 0x133   : > { %v785_v58 = vcombine.high %v784_v57, %v784_v57  ;;  %v788_v59 = vpack.c.bf16 %v784_v57, %v784_v57 }
 0x134   : > { %1128 = vmatpush3.bf16.msra.mxu0 %v1264_v42 }
 0x135   : > { %1129 = vmatprep.subr.bf16.mxu0 %v1265_v43  ;;  %v789_v60 = vpack.c.bf16 %v785_v58, %v785_v58 }
 0x137   : > { %957 = vmatprep.mubr.bf16.mxu0 %v789_v60 }
 0x138   : > { %1130 = vmatpush3.bf16.msra.mxu0 %v1266_v47 }
 0x139   : > { %1131 = vmatprep.subr.bf16.mxu0 %v1267_v49 }
 0x13c   : > { %1132 = vmatpush3.bf16.msra.mxu0 %v1268_v52 }
 0x13d   : > { %1133 = vmatprep.subr.bf16.mxu0 %v1269_v54 }
 0x140   : > { %1134 = vmatpush3.bf16.msra.mxu0 %v1270_v56 }
 0x143   : > { %958 = vmatmul.mubr.bf16.vlgmr.msra.gmra.mxu0 %v788_v59 }
 0x203   : > { %v1135_v61 = vpop.f32.mrf.mxu0 }
 0x205   : > { %v1136_v63 = vpop.f32.mrf.mxu0 }
 0x206   : > { %v1137_v0 = vadd.f32 %v1136_v63, %v1135_v61 }
 0x207   : > { %v1138_v1 = vpop.f32.mrf.mxu0 }
 0x208   : > { %v960_v2 = vadd.f32 %v1137_v0, %v1097_v62 }
 0x209   : > { %v1139_v3 = vpop.f32.mrf.mxu0 }
 0x20a   : > { %966 = vst.msk [vmem:[#allocation3] sm:$0x3] %vm965_vm0, %v960_v2 }
 0x20b PF: > { %p1145_p7 = scmp.eq.s32.totalorder %s1347_s19, 3  ;;  %s1310_s21 = smov [#allocation3]  }
 0x20c   : > { %s974_s22 = sshll.u32 %s1310_s21, 4  ;;  %s975_s22 = int_to_ptr.vmem [resolvable:$true] %s974_s22 }
 0x20d   : > { %s1271_s23 = scalar_lea.vmem %s975_s22, 32  ;;  %p1278_p11 = scmp.lt.s32.totalorder %s975_s22, %s975_s22 }
 0x20e   : > { %p1272_p8 = scmp.ne.s32.totalorder %s975_s22, %s1271_s23  ;;  %p1279_p12 = scmp.lt.s32.totalorder %s1271_s23, %s1271_s23 }
 0x210   : > { %p1273_p9 = pnand %p1272_p8, %p1145_p7  ;;  %p1280_p13 = por %p1279_p12, %p1278_p11 }
 0x212   : > { %p1274_p10 = pneg %p1273_p9 }
 0x214   : > { %p1281_p0 = pnand %p1280_p13, %p1274_p10 }
 0x216   : > { %1284 = shalt.err (!%p1281_p0)
}
 0x217   : > { %1142 = dma.vmem_to_hbm [thread:$0]  (%p1145_p7), %s975_s22, 32, %s1515_s5, [#allocation4]  }
 0x218   : > { %1300 = dma.done.wait (%p1145_p7), [#allocation4], 32  }
 0x219   : > { %1302 = vsyncadd (%p1145_p7), [#allocation4], 4294967264 }
 0x21a PF: > { %s16_s18 = sadd.s32 1, %s1305_s18  }
 0x21b   : > { %p13_p1 = scmp.ge.s32.totalorder %s16_s18, 6  }
 0x21d   :  { %15 = sbr.rel (!%p13_p1) target bundleno = 1 (0x1), region = 78 }
 0x222   :  { %987 = vsyncpa [#allocation4], 1 }
 0x223   :  { %989 = vsyncpa [#allocation4 + $0x1], 1 }

</bundles_post_ra>
